<compile_context>
chip_gen: v5e
topology: v5e:2x2
jax: 0.10.0
libtpu: 0.0.40
codegen_flags: <defaults>
</compile_context>

<pallas_src>
import functools

import jax
import jax.numpy as jnp
from jax.experimental import pallas as pl
from jax.experimental.pallas import tpu as pltpu

WIN_PAD = 8            # sublane-aligned time halo (>= 7 required by the k=15 conv)
MS_CH = 128            # 4 branches x 32 channels
BN_EPS = 1e-5


def _round_up(a, m):
    return ((a + m - 1) // m) * m


def _tpu_vmem_bytes():
    try:
        info = pltpu.get_tpu_info()
        cap = getattr(info, "vmem_capacity_bytes", None)
        if cap:
            return int(cap)
    except Exception:
        pass
    return 64 * 1024 * 1024


# ----------------------------------------------------------------------------------
# Pass 1: fused multi-scale conv block (materialized to HBM in bf16) + tiled global
#         sum/max pooling + channel-attention MLP + sigmoid.
# ----------------------------------------------------------------------------------
def attn_stats_kernel(xp_hbm, enh_ref, wtap_ref, wfreq_ref, bms_ref, watt_ref,
                      ms_ref, attn_ref, xbuf, sum_sc, max_sc, sem,
                      *, t_tile, inv_t, t_valid, needs_mask):
    b = pl.program_id(0)
    t = pl.program_id(1)
    nt = pl.num_programs(1)
    win = t_tile + 2 * WIN_PAD
    slot = t % 2

    def start_copy(tile_idx, s):
        row0 = pl.multiple_of(tile_idx * t_tile, 8)   # tiles are sublane aligned
        pltpu.make_async_copy(
            xp_hbm.at[b, pl.ds(row0, win), :], xbuf.at[s], sem.at[s]).start()

    @pl.when(t == 0)
    def _init():
        sum_sc[...] = jnp.zeros(sum_sc.shape, sum_sc.dtype)
        max_sc[...] = jnp.full(max_sc.shape, -jnp.inf, max_sc.dtype)
        start_copy(t, slot)              # prime this batch's first halo window

    @pl.when(t + 1 < nt)
    def _prefetch():
        start_copy(t + 1, 1 - slot)      # hide the next tile's halo copy behind compute

    # Frequency-aware 1x1 branch first: its input arrives via BlockSpec pipelining,
    # so this matmul runs while the halo DMA for this tile may still be in flight.
    acc = jnp.dot(enh_ref[0], wfreq_ref[...], preferred_element_type=jnp.float32)

    pltpu.make_async_copy(
        xp_hbm.at[b, pl.ds(0, win), :], xbuf.at[slot], sem.at[slot]).wait()

    # Fused k=3 / k=7 / k=15 conv tap stack (disjoint output lanes 0..95) on the raw
    # input window; lanes 96..127 carry the freq branch accumulated above.
    # TODO(synk): tap-packed K=256 contractions / im2col for small C_in (MXU-shape
    # item from the perf review) is a follow-up; taps stay K=C_LANE here.
    for d in range(15):
        xs = xbuf[slot, pl.ds(d + 1, t_tile), :]
        acc = acc + jnp.dot(xs, wtap_ref[d], preferred_element_type=jnp.float32)

    ms = jnp.maximum(acc + bms_ref[...], 0.0)        # ReLU'd multi-scale block
    ms_ref[0] = ms.astype(ms_ref.dtype)              # materialize for pass 2 (bf16)

    if needs_mask:                                   # mask padded rows out of pooling
        row = t * t_tile + jax.lax.broadcasted_iota(jnp.int32, (t_tile, 1), 0)
        valid = row < t_valid
        ms_sum = jnp.where(valid, ms, 0.0)
        ms_max = jnp.where(valid, ms, -jnp.inf)
    else:
        ms_sum, ms_max = ms, ms

    sum_sc[...] = sum_sc[...] + jnp.sum(ms_sum, axis=0, keepdims=True)
    max_sc[...] = jnp.maximum(max_sc[...], jnp.max(ms_max, axis=0, keepdims=True))

    @pl.when(t == nt - 1)
    def _finalize():
        avg = (sum_sc[...] * inv_t).astype(jnp.bfloat16)   # AdaptiveAvgPool1d(1)
        mxv = max_sc[...].astype(jnp.bfloat16)             # AdaptiveMaxPool1d(1)

        def mlp(v):                # shared 1x1-conv MLP, no bias: 128 -> 8 -> 128
            h = jnp.maximum(
                jnp.dot(v, watt_ref[0], preferred_element_type=jnp.float32), 0.0)
            return jnp.dot(h.astype(jnp.bfloat16), watt_ref[1],
                           preferred_element_type=jnp.float32)

        attn_ref[0] = jax.nn.sigmoid(mlp(avg) + mlp(mxv))


# ----------------------------------------------------------------------------------
# Pass 2: attention scaling + fusion (two 1x1 convs, BN folded) + f32 residual + ReLU
# ----------------------------------------------------------------------------------
def fuse_kernel(ms_ref, attn_ref, res_ref, w1_ref, b1_ref, w2_ref, b2_ref, o_ref):
    att = (ms_ref[0].astype(jnp.float32) * attn_ref[0]).astype(jnp.bfloat16)
    h1 = jnp.maximum(
        jnp.dot(att, w1_ref[...], preferred_element_type=jnp.float32) + b1_ref[...],
        0.0)
    h2 = (jnp.dot(h1.astype(jnp.bfloat16), w2_ref[...],
                  preferred_element_type=jnp.float32) + b2_ref[...])
    # identity residual on the raw f32 input (exactly matches the PyTorch module)
    o_ref[0] = jnp.maximum(h2 + res_ref[0], 0.0).astype(o_ref.dtype)


# ----------------------------------------------------------------------------------
# Parameters
# ----------------------------------------------------------------------------------
def _fold_bn(w, b, gamma, beta, mean, var):
    """Fold eval-mode BatchNorm1d into a preceding 1x1 conv."""
    s = gamma / jnp.sqrt(var + BN_EPS)
    return w * s[None, :], (b * s + beta - mean * s)[None, :]


def init_params(key, C_in, C_out):
    ks = list(jax.random.split(key, 32))
    nk = iter(ks)

    def nrm(shape, scale=0.1):
        return scale * jax.random.normal(next(nk), shape, jnp.float32)

    def bn_stats(n):
        gamma = 1.0 + 0.1 * jax.random.normal(next(nk), (n,), jnp.float32)
        beta = 0.1 * jax.random.normal(next(nk), (n,), jnp.float32)
        mean = 0.1 * jax.random.normal(next(nk), (n,), jnp.float32)
        var = 0.5 + jax.random.uniform(next(nk), (n,), jnp.float32)
        return gamma, beta, mean, var

    # conv branches: torch weight [32, C_in, k] stored here as [k, C_in, 32]
    ws, bs = nrm((3, C_in, 32)), nrm((1, 32))
    wm, bm = nrm((7, C_in, 32)), nrm((1, 32))
    wl, bl = nrm((15, C_in, 32)), nrm((1, 32))

    # frequency-aware mapping (1x1 conv) + its BatchNorm (folded, eval mode)
    wq0, bq0 = nrm((C_in, 32)), nrm((32,))
    wq, bq = _fold_bn(wq0, bq0, *bn_stats(32))

    # channel attention MLP (bias=False): 128 -> 8 -> 128
    wa1 = nrm((128, 8))
    wa2 = nrm((8, 128))

    # fusion: 128 -> 64 (conv+BN folded, ReLU), 64 -> C_out (conv+BN folded)
    w1_0, b1_0 = nrm((128, 64)), nrm((64,))
    w1, b1 = _fold_bn(w1_0, b1_0, *bn_stats(64))
    w2_0, b2_0 = nrm((64, C_out)), nrm((C_out,))
    w2, b2 = _fold_bn(w2_0, b2_0, *bn_stats(C_out))

    return (ws, bs, wm, bm, wl, bl, wq, bq, wa1, wa2, w1, b1, w2, b2)


def pack_params(params, C_LANE):
    """Pack / zero-pad parameters into a few lane-dense bf16 arrays."""
    ws, bs, wm, bm, wl, bl, wq, bq, wa1, wa2, w1, b1, w2, b2 = params
    C_in = ws.shape[1]
    C_out = w2.shape[1]
    f32 = jnp.float32

    # fused conv tap stack: tap d corresponds to x[t + d - 7]
    wtap = jnp.zeros((15, C_LANE, MS_CH), f32)
    wtap = wtap.at[6:9, :C_in, 0:32].set(ws)      # k=3  (pad 1) -> taps 6..8
    wtap = wtap.at[4:11, :C_in, 32:64].set(wm)    # k=7  (pad 3) -> taps 4..10
    wtap = wtap.at[0:15, :C_in, 64:96].set(wl)    # k=15 (pad 7) -> taps 0..14
    # freq 1x1 conv (BN folded) applied to the enhanced input, lanes 96..127
    wfreq = jnp.zeros((C_LANE, MS_CH), f32).at[:C_in, 96:128].set(wq)
    bms = jnp.concatenate([bs, bm, bl, bq], axis=-1)                  # [1, 128]

    # attention MLP, zero-padded to lane-dense [128,128] blocks
    watt = jnp.zeros((2, MS_CH, MS_CH), f32)
    watt = watt.at[0, :, :wa1.shape[1]].set(wa1)                      # 128 -> 8
    watt = watt.at[1, :wa2.shape[0], :].set(wa2)                      # 8  -> 128

    # fusion convs (BN folded); second conv kept at N = C_out (un-padded output)
    w1p = jnp.zeros((MS_CH, MS_CH), f32).at[:, :w1.shape[1]].set(w1)
    b1p = jnp.zeros((1, MS_CH), f32).at[:, :b1.shape[1]].set(b1)
    w2p = jnp.zeros((MS_CH, C_out), f32).at[:w2.shape[0], :].set(w2)
    b2p = b2                                                          # [1, C_out]

    bf16 = lambda a: a.astype(jnp.bfloat16)
    return (bf16(wtap), bf16(wfreq), bms, bf16(watt), bf16(w1p), b1p, bf16(w2p), b2p)


# ----------------------------------------------------------------------------------
# Forward pass
# ----------------------------------------------------------------------------------
@functools.partial(jax.jit, static_argnames=("fs",))
def msh_forward(x, params, fs=100):
    """x: [B, C_in, T] float32 (PyTorch NCT layout). Returns [B, C_out, T]."""
    B, C_in, T = x.shape
    C_out = params[-2].shape[-1]
    assert C_in == C_out, "identity residual_proj requires in_channels == out_channels"
    C_LANE = max(MS_CH, _round_up(C_in, 128))

    # Generation-aware tiling / VMEM budget (v5e/v6e: 128 MiB, v7x: 64 MiB).
    vmem_cap = _tpu_vmem_bytes()
    vmem_limit = int(min(0.85 * vmem_cap, 112 * 1024 * 1024))
    t_cap = 8192 if vmem_cap > 80 * 1024 * 1024 else 4096
    nt = max(1, -(-T // t_cap))
    t_tile = _round_up(-(-T // nt), 8)
    T_pad = nt * t_tile
    needs_mask = (T_pad != T)

    # FrequencyAwareModule FFT tremor-band enhancement.
    # TODO(synk): rfft/irfft has no Pallas TPU equivalent; stays in plain JAX.
    x_fft = jnp.fft.rfft(x, axis=2)
    freqs = jnp.fft.rfftfreq(T, d=1.0 / fs)
    mask = ((freqs >= 3.0) & (freqs <= 7.0)).astype(jnp.float32)
    enhanced = jnp.fft.irfft(x_fft * (1.0 + 0.5 * mask)[None, None, :], n=T, axis=2)

    # Channels-last views; the f32 view doubles as the residual input for pass 2.
    x_tl = jnp.transpose(x, (0, 2, 1))            # [B, T, C_in] f32
    enh_tl = jnp.transpose(enhanced, (0, 2, 1))   # [B, T, C_in] f32

    if needs_mask:
        res = jnp.zeros((B, T_pad, C_in), jnp.float32).at[:, :T, :].set(x_tl)
    else:
        res = x_tl

    # TODO(synk): xp / enh are still zero-padded to C_LANE lanes in HBM so every MXU
    # contraction stays a known-good lane-dense K=C_LANE matmul; the un-padded HBM
    # layout (perf-review item) is a follow-up.
    xp = jnp.zeros((B, T_pad + 2 * WIN_PAD, C_LANE), jnp.bfloat16)
    xp = xp.at[:, WIN_PAD:WIN_PAD + T, :C_in].set(x_tl.astype(jnp.bfloat16))
    enh_p = jnp.zeros((B, T_pad, C_LANE), jnp.bfloat16)
    enh_p = enh_p.at[:, :T, :C_in].set(enh_tl.astype(jnp.bfloat16))

    wtap, wfreq, bms, watt, w1p, b1p, w2p, b2p = pack_params(params, C_LANE)

    def full_spec(a):
        return pl.BlockSpec(a.shape, lambda b, t: (0,) * a.ndim)

    hbm_spec = pl.BlockSpec(memory_space=pl.ANY)   # manual halo DMA inside pass 1
    enh_spec = pl.BlockSpec((1, t_tile, C_LANE), lambda b, t: (b, t, 0))
    ms_spec = pl.BlockSpec((1, t_tile, MS_CH), lambda b, t: (b, t, 0))
    attn_spec = pl.BlockSpec((1, 1, MS_CH), lambda b, t: (b, 0, 0))

    # --- pass 1: multi-scale block (materialized) + global channel attention ---
    # TODO(synk): for B == 1 on v7x only the batch axis is 'parallel' here; splitting
    # the reduction across the two TensorCores is a follow-up.
    ms, attn = pl.pallas_call(
        functools.partial(attn_stats_kernel, t_tile=t_tile, inv_t=1.0 / T,
                          t_valid=T, needs_mask=needs_mask),
        out_shape=(jax.ShapeDtypeStruct((B, T_pad, MS_CH), jnp.bfloat16),
                   jax.ShapeDtypeStruct((B, 1, MS_CH), jnp.float32)),
        grid=(B, nt),
        in_specs=[hbm_spec, enh_spec,
                  full_spec(wtap), full_spec(wfreq), full_spec(bms), full_spec(watt)],
        out_specs=(ms_spec, attn_spec),
        scratch_shapes=[
            pltpu.VMEM((2, t_tile + 2 * WIN_PAD, C_LANE), jnp.bfloat16),
            pltpu.VMEM((1, MS_CH), jnp.float32),
            pltpu.VMEM((1, MS_CH), jnp.float32),
            pltpu.SemaphoreType.DMA((2,)),
        ],
        compiler_params=pltpu.CompilerParams(
            dimension_semantics=("parallel", "arbitrary"),
            vmem_limit_bytes=vmem_limit),
    )(xp, enh_p, wtap, wfreq, bms, watt)

    # --- pass 2: attention scaling + fusion + f32 residual + ReLU ---
    out_p = pl.pallas_call(
        fuse_kernel,
        out_shape=jax.ShapeDtypeStruct((B, T_pad, C_out), jnp.float32),
        grid=(B, nt),
        in_specs=[ms_spec, attn_spec,
                  pl.BlockSpec((1, t_tile, C_in), lambda b, t: (b, t, 0)),
                  full_spec(w1p), full_spec(b1p), full_spec(w2p), full_spec(b2p)],
        out_specs=pl.BlockSpec((1, t_tile, C_out), lambda b, t: (b, t, 0)),
        compiler_params=pltpu.CompilerParams(
            dimension_semantics=("parallel", "parallel"),
            vmem_limit_bytes=vmem_limit),
    )(ms, attn, res, w1p, b1p, w2p, b2p)

    if needs_mask:
        out_p = out_p[:, :T, :]
    return jnp.transpose(out_p, (0, 2, 1))   # back to [B, C_out, T]


# ----------------------------------------------------------------------------------
# Pure-JAX reference (same folded params) for a correctness cross-check
# ----------------------------------------------------------------------------------
def msh_reference(x, params, fs=100):
    ws, bs, wm, bm, wl, bl, wq, bq, wa1, wa2, w1, b1, w2, b2 = params
    _, _, T = x.shape
    x_fft = jnp.fft.rfft(x, axis=2)
    freqs = jnp.fft.rfftfreq(T, d=1.0 / fs)
    mask = ((freqs >= 3.0) & (freqs <= 7.0)).astype(jnp.float32)
    enh = jnp.fft.irfft(x_fft * (1.0 + 0.5 * mask)[None, None, :], n=T, axis=2)
    xt = jnp.transpose(x, (0, 2, 1))
    et = jnp.transpose(enh, (0, 2, 1))

    def conv(w, b):
        k = w.shape[0]
        p = (k - 1) // 2
        xpad = jnp.pad(xt, ((0, 0), (p, p), (0, 0)))
        acc = sum(jnp.einsum('btc,cd->btd', xpad[:, j:j + T, :], w[j]) for j in range(k))
        return jax.nn.relu(acc + b)

    feat_freq = jax.nn.relu(jnp.einsum('btc,cd->btd', et, wq) + bq)
    ms = jnp.concatenate([conv(ws, bs), conv(wm, bm), conv(wl, bl), feat_freq], axis=-1)
    avg = jnp.mean(ms, axis=1, keepdims=True)
    mx = jnp.max(ms, axis=1, keepdims=True)
    mlp = lambda v: jnp.einsum(
        'bsc,cd->bsd', jax.nn.relu(jnp.einsum('bsc,cd->bsd', v, wa1)), wa2)
    attn = jax.nn.sigmoid(mlp(avg) + mlp(mx))
    att = ms * attn
    h1 = jax.nn.relu(jnp.einsum('btc,cd->btd', att, w1) + b1)
    h2 = jnp.einsum('btc,cd->btd', h1, w2) + b2
    out = jax.nn.relu(h2 + xt)
    return jnp.transpose(out, (0, 2, 1))


if __name__ == "__main__":
    key = jax.random.PRNGKey(0)
    B, C_in, C_out, T = 2, 16, 16, 64
    kx, kp = jax.random.split(key)
    x = jax.random.normal(kx, (B, C_in, T), jnp.float32)
    params = init_params(kp, C_in, C_out)

    out = jax.block_until_ready(msh_forward(x, params))
    assert out.shape == (B, C_out, T)
    assert bool(jnp.all(jnp.isfinite(out)))

    ref = msh_reference(x, params)
    err = float(jnp.max(jnp.abs(out - ref)))
    assert err < 1e-1, f"mismatch vs reference: {err}"   # bf16-MXU tolerance
    print("KERNEL_OK")
</pallas_src>

<mosaic_0001>
module attributes {stable_mosaic.version = 11 : i64} {
  func.func @attn_stats_kernel(%arg0: i32, %arg1: i32, %arg2: memref<2x80x128xbf16, #tpu.memory_space<any>>, %arg3: memref<1x64x128xbf16, #tpu.memory_space<vmem>>, %arg4: memref<15x128x128xbf16, #tpu.memory_space<vmem>>, %arg5: memref<128x128xbf16, #tpu.memory_space<vmem>>, %arg6: memref<1x128xf32, #tpu.memory_space<vmem>>, %arg7: memref<2x128x128xbf16, #tpu.memory_space<vmem>>, %arg8: memref<1x64x128xbf16, #tpu.memory_space<vmem>>, %arg9: memref<1x1x128xf32, #tpu.memory_space<vmem>>, %arg10: memref<2x80x128xbf16, #tpu.memory_space<vmem>>, %arg11: memref<1x128xf32, #tpu.memory_space<vmem>>, %arg12: memref<1x128xf32, #tpu.memory_space<vmem>>, %arg13: memref<2x!tpu.dma_semaphore, #tpu.memory_space<semaphore_mem>>) attributes {dimension_semantics = [#tpu.dimension_semantics<parallel>, #tpu.dimension_semantics<arbitrary>], iteration_bounds = array<i64: 2, 1>, scalar_prefetch = 0 : i64, scratch_operands = 4 : i64, tpu.core_type = #tpu.core_type<tc>, window_params = [{}, {transform_indices = @transform_1, window_bounds = array<i64: 1, 64, 128>}, {pipeline_mode = #tpu.pipeline_mode<synchronous>, transform_indices = @transform_2, window_bounds = array<i64: 15, 128, 128>}, {pipeline_mode = #tpu.pipeline_mode<synchronous>, transform_indices = @transform_3, window_bounds = array<i64: 128, 128>}, {pipeline_mode = #tpu.pipeline_mode<synchronous>, transform_indices = @transform_4, window_bounds = array<i64: 1, 128>}, {pipeline_mode = #tpu.pipeline_mode<synchronous>, transform_indices = @transform_5, window_bounds = array<i64: 2, 128, 128>}, {transform_indices = @transform_6, window_bounds = array<i64: 1, 64, 128>}, {transform_indices = @transform_7, window_bounds = array<i64: 1, 1, 128>}]} {
    %c2_i32 = arith.constant 2 : i32
    %c0_i32 = arith.constant 0 : i32
    %0 = arith.cmpi eq, %c2_i32, %c0_i32 : i32
    %c1_i32 = arith.constant 1 : i32
    %1 = arith.select %0, %c1_i32, %c2_i32 : i32
    %2 = arith.remsi %arg1, %1 : i32
    %c0_i32_0 = arith.constant 0 : i32
    %3 = arith.cmpi ne, %2, %c0_i32_0 : i32
    %c0_i32_1 = arith.constant 0 : i32
    %4 = arith.cmpi slt, %2, %c0_i32_1 : i32
    %c0_i32_2 = arith.constant 0 : i32
    %5 = arith.cmpi slt, %1, %c0_i32_2 : i32
    %6 = arith.xori %4, %5 : i1
    %7 = arith.andi %6, %3 : i1
    %8 = arith.addi %2, %1 : i32
    %9 = arith.select %7, %8, %2 : i32
    %c0_i32_3 = arith.constant 0 : i32
    %10 = arith.cmpi eq, %arg1, %c0_i32_3 : i32
    %11 = arith.extui %10 : i1 to i32
    %c0_i32_4 = arith.constant 0 : i32
    %12 = arith.cmpi ne, %11, %c0_i32_4 : i32
    scf.if %12 {
      %cst_109 = arith.constant 0.000000e+00 : f32
      %154 = vector.broadcast %cst_109 : f32 to vector<1x128xf32>
      %c0_110 = arith.constant 0 : index
      %c0_111 = arith.constant 0 : index
      %155 = vector.load %arg11[%c0_110, %c0_111] : memref<1x128xf32, #tpu.memory_space<vmem>>, vector<1x128xf32>
      tpu.vector_store %arg11[%c0_110, %c0_111], %154 {strides = array<i32>} : memref<1x128xf32, #tpu.memory_space<vmem>>, vector<1x128xf32>,
      %cst_112 = arith.constant 0xFF800000 : f32
      %156 = vector.broadcast %cst_112 : f32 to vector<1x128xf32>
      %c0_113 = arith.constant 0 : index
      %c0_114 = arith.constant 0 : index
      %157 = vector.load %arg12[%c0_113, %c0_114] : memref<1x128xf32, #tpu.memory_space<vmem>>, vector<1x128xf32>
      tpu.vector_store %arg12[%c0_113, %c0_114], %156 {strides = array<i32>} : memref<1x128xf32, #tpu.memory_space<vmem>>, vector<1x128xf32>,
      %c64_i32 = arith.constant 64 : i32
      %158 = arith.muli %arg1, %c64_i32 : i32
      %159 = tpu.assume_multiple %158, 8 : i32
      %c0_i32_115 = arith.constant 0 : i32
      %160 = tpu.memref_slice %arg2[%arg0, %159, %c0_i32_115] : memref<2x80x128xbf16, #tpu.memory_space<any>> -> memref<1x80x128xbf16, #tpu.memory_space<any>>
      %161 = tpu.memref_squeeze %160 : memref<1x80x128xbf16, #tpu.memory_space<any>> -> memref<80x128xbf16, #tpu.memory_space<any>>
      %c0_i32_116 = arith.constant 0 : i32
      %c0_i32_117 = arith.constant 0 : i32
      %162 = tpu.memref_slice %arg10[%9, %c0_i32_116, %c0_i32_117] : memref<2x80x128xbf16, #tpu.memory_space<vmem>> -> memref<1x80x128xbf16, #tpu.memory_space<vmem>>
      %163 = tpu.memref_squeeze %162 : memref<1x80x128xbf16, #tpu.memory_space<vmem>> -> memref<80x128xbf16, #tpu.memory_space<vmem>>
      %164 = tpu.memref_slice %arg13[%9] : memref<2x!tpu.dma_semaphore, #tpu.memory_space<semaphore_mem>> -> memref<1x!tpu.dma_semaphore, #tpu.memory_space<semaphore_mem>>
      %165 = tpu.memref_squeeze %164 : memref<1x!tpu.dma_semaphore, #tpu.memory_space<semaphore_mem>> -> memref<!tpu.dma_semaphore, #tpu.memory_space<semaphore_mem>>
      tpu.enqueue_dma source(%161 : memref<80x128xbf16, #tpu.memory_space<any>>) target(%163 : memref<80x128xbf16, #tpu.memory_space<vmem>>) target_semaphore(%165 : memref<!tpu.dma_semaphore, #tpu.memory_space<semaphore_mem>>)
    } else {
    }
    %c1_i32_5 = arith.constant 1 : i32
    %13 = arith.addi %arg1, %c1_i32_5 : i32
    %c1_i32_6 = arith.constant 1 : i32
    %14 = arith.cmpi slt, %13, %c1_i32_6 : i32
    %15 = arith.extui %14 : i1 to i32
    %c0_i32_7 = arith.constant 0 : i32
    %16 = arith.cmpi ne, %15, %c0_i32_7 : i32
    scf.if %16 {
      %c1_i32_109 = arith.constant 1 : i32
      %154 = arith.addi %arg1, %c1_i32_109 : i32
      %c1_i32_110 = arith.constant 1 : i32
      %155 = arith.subi %c1_i32_110, %9 : i32
      %c64_i32 = arith.constant 64 : i32
      %156 = arith.muli %154, %c64_i32 : i32
      %157 = tpu.assume_multiple %156, 8 : i32
      %c0_i32_111 = arith.constant 0 : i32
      %158 = tpu.memref_slice %arg2[%arg0, %157, %c0_i32_111] : memref<2x80x128xbf16, #tpu.memory_space<any>> -> memref<1x80x128xbf16, #tpu.memory_space<any>>
      %159 = tpu.memref_squeeze %158 : memref<1x80x128xbf16, #tpu.memory_space<any>> -> memref<80x128xbf16, #tpu.memory_space<any>>
      %c0_i32_112 = arith.constant 0 : i32
      %c0_i32_113 = arith.constant 0 : i32
      %160 = tpu.memref_slice %arg10[%155, %c0_i32_112, %c0_i32_113] : memref<2x80x128xbf16, #tpu.memory_space<vmem>> -> memref<1x80x128xbf16, #tpu.memory_space<vmem>>
      %161 = tpu.memref_squeeze %160 : memref<1x80x128xbf16, #tpu.memory_space<vmem>> -> memref<80x128xbf16, #tpu.memory_space<vmem>>
      %162 = tpu.memref_slice %arg13[%155] : memref<2x!tpu.dma_semaphore, #tpu.memory_space<semaphore_mem>> -> memref<1x!tpu.dma_semaphore, #tpu.memory_space<semaphore_mem>>
      %163 = tpu.memref_squeeze %162 : memref<1x!tpu.dma_semaphore, #tpu.memory_space<semaphore_mem>> -> memref<!tpu.dma_semaphore, #tpu.memory_space<semaphore_mem>>
      tpu.enqueue_dma source(%159 : memref<80x128xbf16, #tpu.memory_space<any>>) target(%161 : memref<80x128xbf16, #tpu.memory_space<vmem>>) target_semaphore(%163 : memref<!tpu.dma_semaphore, #tpu.memory_space<semaphore_mem>>)
    } else {
    }
    %c0 = arith.constant 0 : index
    %c0_8 = arith.constant 0 : index
    %c0_9 = arith.constant 0 : index
    %17 = vector.load %arg3[%c0, %c0_8, %c0_9] : memref<1x64x128xbf16, #tpu.memory_space<vmem>>, vector<1x64x128xbf16>
    %18 = vector.shape_cast %17 : vector<1x64x128xbf16> to vector<64x128xbf16>
    %c0_10 = arith.constant 0 : index
    %c0_11 = arith.constant 0 : index
    %19 = vector.load %arg5[%c0_10, %c0_11] : memref<128x128xbf16, #tpu.memory_space<vmem>>, vector<128x128xbf16>
    %cst = arith.constant dense<0.000000e+00> : vector<64x128xf32>
    %20 = tpu.matmul %18, %19, %cst {dimension_numbers = #tpu.dot_dimension_numbers<[1], [0], [0], [1], [0, 0, 1, 1], [], []>} : vector<64x128xbf16>, vector<128x128xbf16>, vector<64x128xf32> -> vector<64x128xf32>
    %c0_i32_12 = arith.constant 0 : i32
    %c0_i32_13 = arith.constant 0 : i32
    %21 = tpu.memref_slice %arg2[%arg0, %c0_i32_12, %c0_i32_13] : memref<2x80x128xbf16, #tpu.memory_space<any>> -> memref<1x80x128xbf16, #tpu.memory_space<any>>
    %22 = tpu.memref_squeeze %21 : memref<1x80x128xbf16, #tpu.memory_space<any>> -> memref<80x128xbf16, #tpu.memory_space<any>>
    %c0_i32_14 = arith.constant 0 : i32
    %c0_i32_15 = arith.constant 0 : i32
    %23 = tpu.memref_slice %arg10[%9, %c0_i32_14, %c0_i32_15] : memref<2x80x128xbf16, #tpu.memory_space<vmem>> -> memref<1x80x128xbf16, #tpu.memory_space<vmem>>
    %24 = tpu.memref_squeeze %23 : memref<1x80x128xbf16, #tpu.memory_space<vmem>> -> memref<80x128xbf16, #tpu.memory_space<vmem>>
    %25 = tpu.memref_slice %arg13[%9] : memref<2x!tpu.dma_semaphore, #tpu.memory_space<semaphore_mem>> -> memref<1x!tpu.dma_semaphore, #tpu.memory_space<semaphore_mem>>
    %26 = tpu.memref_squeeze %25 : memref<1x!tpu.dma_semaphore, #tpu.memory_space<semaphore_mem>> -> memref<!tpu.dma_semaphore, #tpu.memory_space<semaphore_mem>>
    tpu.wait_dma2 semaphore(%26 : memref<!tpu.dma_semaphore, #tpu.memory_space<semaphore_mem>>) src(%22 : memref<80x128xbf16, #tpu.memory_space<any>>) dst(%24 : memref<80x128xbf16, #tpu.memory_space<vmem>>)
    %27 = arith.index_cast %9 : i32 to index
    %c1 = arith.constant 1 : index
    %c0_16 = arith.constant 0 : index
    %28 = vector.load %arg10[%27, %c1, %c0_16] : memref<2x80x128xbf16, #tpu.memory_space<vmem>>, vector<1x64x128xbf16>
    %29 = vector.shape_cast %28 : vector<1x64x128xbf16> to vector<64x128xbf16>
    %c0_17 = arith.constant 0 : index
    %c0_18 = arith.constant 0 : index
    %c0_19 = arith.constant 0 : index
    %30 = vector.load %arg4[%c0_17, %c0_18, %c0_19] : memref<15x128x128xbf16, #tpu.memory_space<vmem>>, vector<1x128x128xbf16>
    %31 = vector.shape_cast %30 : vector<1x128x128xbf16> to vector<128x128xbf16>
    %cst_20 = arith.constant dense<0.000000e+00> : vector<64x128xf32>
    %32 = tpu.matmul %29, %31, %cst_20 {dimension_numbers = #tpu.dot_dimension_numbers<[1], [0], [0], [1], [0, 0, 1, 1], [], []>} : vector<64x128xbf16>, vector<128x128xbf16>, vector<64x128xf32> -> vector<64x128xf32>
    %33 = arith.addf %20, %32 : vector<64x128xf32>
    %34 = arith.index_cast %9 : i32 to index
    %c2 = arith.constant 2 : index
    %c0_21 = arith.constant 0 : index
    %35 = vector.load %arg10[%34, %c2, %c0_21] : memref<2x80x128xbf16, #tpu.memory_space<vmem>>, vector<1x64x128xbf16>
    %36 = vector.shape_cast %35 : vector<1x64x128xbf16> to vector<64x128xbf16>
    %c1_22 = arith.constant 1 : index
    %c0_23 = arith.constant 0 : index
    %c0_24 = arith.constant 0 : index
    %37 = vector.load %arg4[%c1_22, %c0_23, %c0_24] : memref<15x128x128xbf16, #tpu.memory_space<vmem>>, vector<1x128x128xbf16>
    %38 = vector.shape_cast %37 : vector<1x128x128xbf16> to vector<128x128xbf16>
    %cst_25 = arith.constant dense<0.000000e+00> : vector<64x128xf32>
    %39 = tpu.matmul %36, %38, %cst_25 {dimension_numbers = #tpu.dot_dimension_numbers<[1], [0], [0], [1], [0, 0, 1, 1], [], []>} : vector<64x128xbf16>, vector<128x128xbf16>, vector<64x128xf32> -> vector<64x128xf32>
    %40 = arith.addf %33, %39 : vector<64x128xf32>
    %41 = arith.index_cast %9 : i32 to index
    %c3 = arith.constant 3 : index
    %c0_26 = arith.constant 0 : index
    %42 = vector.load %arg10[%41, %c3, %c0_26] : memref<2x80x128xbf16, #tpu.memory_space<vmem>>, vector<1x64x128xbf16>
    %43 = vector.shape_cast %42 : vector<1x64x128xbf16> to vector<64x128xbf16>
    %c2_27 = arith.constant 2 : index
    %c0_28 = arith.constant 0 : index
    %c0_29 = arith.constant 0 : index
    %44 = vector.load %arg4[%c2_27, %c0_28, %c0_29] : memref<15x128x128xbf16, #tpu.memory_space<vmem>>, vector<1x128x128xbf16>
    %45 = vector.shape_cast %44 : vector<1x128x128xbf16> to vector<128x128xbf16>
    %cst_30 = arith.constant dense<0.000000e+00> : vector<64x128xf32>
    %46 = tpu.matmul %43, %45, %cst_30 {dimension_numbers = #tpu.dot_dimension_numbers<[1], [0], [0], [1], [0, 0, 1, 1], [], []>} : vector<64x128xbf16>, vector<128x128xbf16>, vector<64x128xf32> -> vector<64x128xf32>
    %47 = arith.addf %40, %46 : vector<64x128xf32>
    %48 = arith.index_cast %9 : i32 to index
    %c4 = arith.constant 4 : index
    %c0_31 = arith.constant 0 : index
    %49 = vector.load %arg10[%48, %c4, %c0_31] : memref<2x80x128xbf16, #tpu.memory_space<vmem>>, vector<1x64x128xbf16>
    %50 = vector.shape_cast %49 : vector<1x64x128xbf16> to vector<64x128xbf16>
    %c3_32 = arith.constant 3 : index
    %c0_33 = arith.constant 0 : index
    %c0_34 = arith.constant 0 : index
    %51 = vector.load %arg4[%c3_32, %c0_33, %c0_34] : memref<15x128x128xbf16, #tpu.memory_space<vmem>>, vector<1x128x128xbf16>
    %52 = vector.shape_cast %51 : vector<1x128x128xbf16> to vector<128x128xbf16>
    %cst_35 = arith.constant dense<0.000000e+00> : vector<64x128xf32>
    %53 = tpu.matmul %50, %52, %cst_35 {dimension_numbers = #tpu.dot_dimension_numbers<[1], [0], [0], [1], [0, 0, 1, 1], [], []>} : vector<64x128xbf16>, vector<128x128xbf16>, vector<64x128xf32> -> vector<64x128xf32>
    %54 = arith.addf %47, %53 : vector<64x128xf32>
    %55 = arith.index_cast %9 : i32 to index
    %c5 = arith.constant 5 : index
    %c0_36 = arith.constant 0 : index
    %56 = vector.load %arg10[%55, %c5, %c0_36] : memref<2x80x128xbf16, #tpu.memory_space<vmem>>, vector<1x64x128xbf16>
    %57 = vector.shape_cast %56 : vector<1x64x128xbf16> to vector<64x128xbf16>
    %c4_37 = arith.constant 4 : index
    %c0_38 = arith.constant 0 : index
    %c0_39 = arith.constant 0 : index
    %58 = vector.load %arg4[%c4_37, %c0_38, %c0_39] : memref<15x128x128xbf16, #tpu.memory_space<vmem>>, vector<1x128x128xbf16>
    %59 = vector.shape_cast %58 : vector<1x128x128xbf16> to vector<128x128xbf16>
    %cst_40 = arith.constant dense<0.000000e+00> : vector<64x128xf32>
    %60 = tpu.matmul %57, %59, %cst_40 {dimension_numbers = #tpu.dot_dimension_numbers<[1], [0], [0], [1], [0, 0, 1, 1], [], []>} : vector<64x128xbf16>, vector<128x128xbf16>, vector<64x128xf32> -> vector<64x128xf32>
    %61 = arith.addf %54, %60 : vector<64x128xf32>
    %62 = arith.index_cast %9 : i32 to index
    %c6 = arith.constant 6 : index
    %c0_41 = arith.constant 0 : index
    %63 = vector.load %arg10[%62, %c6, %c0_41] : memref<2x80x128xbf16, #tpu.memory_space<vmem>>, vector<1x64x128xbf16>
    %64 = vector.shape_cast %63 : vector<1x64x128xbf16> to vector<64x128xbf16>
    %c5_42 = arith.constant 5 : index
    %c0_43 = arith.constant 0 : index
    %c0_44 = arith.constant 0 : index
    %65 = vector.load %arg4[%c5_42, %c0_43, %c0_44] : memref<15x128x128xbf16, #tpu.memory_space<vmem>>, vector<1x128x128xbf16>
    %66 = vector.shape_cast %65 : vector<1x128x128xbf16> to vector<128x128xbf16>
    %cst_45 = arith.constant dense<0.000000e+00> : vector<64x128xf32>
    %67 = tpu.matmul %64, %66, %cst_45 {dimension_numbers = #tpu.dot_dimension_numbers<[1], [0], [0], [1], [0, 0, 1, 1], [], []>} : vector<64x128xbf16>, vector<128x128xbf16>, vector<64x128xf32> -> vector<64x128xf32>
    %68 = arith.addf %61, %67 : vector<64x128xf32>
    %69 = arith.index_cast %9 : i32 to index
    %c7 = arith.constant 7 : index
    %c0_46 = arith.constant 0 : index
    %70 = vector.load %arg10[%69, %c7, %c0_46] : memref<2x80x128xbf16, #tpu.memory_space<vmem>>, vector<1x64x128xbf16>
    %71 = vector.shape_cast %70 : vector<1x64x128xbf16> to vector<64x128xbf16>
    %c6_47 = arith.constant 6 : index
    %c0_48 = arith.constant 0 : index
    %c0_49 = arith.constant 0 : index
    %72 = vector.load %arg4[%c6_47, %c0_48, %c0_49] : memref<15x128x128xbf16, #tpu.memory_space<vmem>>, vector<1x128x128xbf16>
    %73 = vector.shape_cast %72 : vector<1x128x128xbf16> to vector<128x128xbf16>
    %cst_50 = arith.constant dense<0.000000e+00> : vector<64x128xf32>
    %74 = tpu.matmul %71, %73, %cst_50 {dimension_numbers = #tpu.dot_dimension_numbers<[1], [0], [0], [1], [0, 0, 1, 1], [], []>} : vector<64x128xbf16>, vector<128x128xbf16>, vector<64x128xf32> -> vector<64x128xf32>
    %75 = arith.addf %68, %74 : vector<64x128xf32>
    %76 = arith.index_cast %9 : i32 to index
    %c8 = arith.constant 8 : index
    %c0_51 = arith.constant 0 : index
    %77 = vector.load %arg10[%76, %c8, %c0_51] : memref<2x80x128xbf16, #tpu.memory_space<vmem>>, vector<1x64x128xbf16>
    %78 = vector.shape_cast %77 : vector<1x64x128xbf16> to vector<64x128xbf16>
    %c7_52 = arith.constant 7 : index
    %c0_53 = arith.constant 0 : index
    %c0_54 = arith.constant 0 : index
    %79 = vector.load %arg4[%c7_52, %c0_53, %c0_54] : memref<15x128x128xbf16, #tpu.memory_space<vmem>>, vector<1x128x128xbf16>
    %80 = vector.shape_cast %79 : vector<1x128x128xbf16> to vector<128x128xbf16>
    %cst_55 = arith.constant dense<0.000000e+00> : vector<64x128xf32>
    %81 = tpu.matmul %78, %80, %cst_55 {dimension_numbers = #tpu.dot_dimension_numbers<[1], [0], [0], [1], [0, 0, 1, 1], [], []>} : vector<64x128xbf16>, vector<128x128xbf16>, vector<64x128xf32> -> vector<64x128xf32>
    %82 = arith.addf %75, %81 : vector<64x128xf32>
    %83 = arith.index_cast %9 : i32 to index
    %c9 = arith.constant 9 : index
    %c0_56 = arith.constant 0 : index
    %84 = vector.load %arg10[%83, %c9, %c0_56] : memref<2x80x128xbf16, #tpu.memory_space<vmem>>, vector<1x64x128xbf16>
    %85 = vector.shape_cast %84 : vector<1x64x128xbf16> to vector<64x128xbf16>
    %c8_57 = arith.constant 8 : index
    %c0_58 = arith.constant 0 : index
    %c0_59 = arith.constant 0 : index
    %86 = vector.load %arg4[%c8_57, %c0_58, %c0_59] : memref<15x128x128xbf16, #tpu.memory_space<vmem>>, vector<1x128x128xbf16>
    %87 = vector.shape_cast %86 : vector<1x128x128xbf16> to vector<128x128xbf16>
    %cst_60 = arith.constant dense<0.000000e+00> : vector<64x128xf32>
    %88 = tpu.matmul %85, %87, %cst_60 {dimension_numbers = #tpu.dot_dimension_numbers<[1], [0], [0], [1], [0, 0, 1, 1], [], []>} : vector<64x128xbf16>, vector<128x128xbf16>, vector<64x128xf32> -> vector<64x128xf32>
    %89 = arith.addf %82, %88 : vector<64x128xf32>
    %90 = arith.index_cast %9 : i32 to index
    %c10 = arith.constant 10 : index
    %c0_61 = arith.constant 0 : index
    %91 = vector.load %arg10[%90, %c10, %c0_61] : memref<2x80x128xbf16, #tpu.memory_space<vmem>>, vector<1x64x128xbf16>
    %92 = vector.shape_cast %91 : vector<1x64x128xbf16> to vector<64x128xbf16>
    %c9_62 = arith.constant 9 : index
    %c0_63 = arith.constant 0 : index
    %c0_64 = arith.constant 0 : index
    %93 = vector.load %arg4[%c9_62, %c0_63, %c0_64] : memref<15x128x128xbf16, #tpu.memory_space<vmem>>, vector<1x128x128xbf16>
    %94 = vector.shape_cast %93 : vector<1x128x128xbf16> to vector<128x128xbf16>
    %cst_65 = arith.constant dense<0.000000e+00> : vector<64x128xf32>
    %95 = tpu.matmul %92, %94, %cst_65 {dimension_numbers = #tpu.dot_dimension_numbers<[1], [0], [0], [1], [0, 0, 1, 1], [], []>} : vector<64x128xbf16>, vector<128x128xbf16>, vector<64x128xf32> -> vector<64x128xf32>
    %96 = arith.addf %89, %95 : vector<64x128xf32>
    %97 = arith.index_cast %9 : i32 to index
    %c11 = arith.constant 11 : index
    %c0_66 = arith.constant 0 : index
    %98 = vector.load %arg10[%97, %c11, %c0_66] : memref<2x80x128xbf16, #tpu.memory_space<vmem>>, vector<1x64x128xbf16>
    %99 = vector.shape_cast %98 : vector<1x64x128xbf16> to vector<64x128xbf16>
    %c10_67 = arith.constant 10 : index
    %c0_68 = arith.constant 0 : index
    %c0_69 = arith.constant 0 : index
    %100 = vector.load %arg4[%c10_67, %c0_68, %c0_69] : memref<15x128x128xbf16, #tpu.memory_space<vmem>>, vector<1x128x128xbf16>
    %101 = vector.shape_cast %100 : vector<1x128x128xbf16> to vector<128x128xbf16>
    %cst_70 = arith.constant dense<0.000000e+00> : vector<64x128xf32>
    %102 = tpu.matmul %99, %101, %cst_70 {dimension_numbers = #tpu.dot_dimension_numbers<[1], [0], [0], [1], [0, 0, 1, 1], [], []>} : vector<64x128xbf16>, vector<128x128xbf16>, vector<64x128xf32> -> vector<64x128xf32>
    %103 = arith.addf %96, %102 : vector<64x128xf32>
    %104 = arith.index_cast %9 : i32 to index
    %c12 = arith.constant 12 : index
    %c0_71 = arith.constant 0 : index
    %105 = vector.load %arg10[%104, %c12, %c0_71] : memref<2x80x128xbf16, #tpu.memory_space<vmem>>, vector<1x64x128xbf16>
    %106 = vector.shape_cast %105 : vector<1x64x128xbf16> to vector<64x128xbf16>
    %c11_72 = arith.constant 11 : index
    %c0_73 = arith.constant 0 : index
    %c0_74 = arith.constant 0 : index
    %107 = vector.load %arg4[%c11_72, %c0_73, %c0_74] : memref<15x128x128xbf16, #tpu.memory_space<vmem>>, vector<1x128x128xbf16>
    %108 = vector.shape_cast %107 : vector<1x128x128xbf16> to vector<128x128xbf16>
    %cst_75 = arith.constant dense<0.000000e+00> : vector<64x128xf32>
    %109 = tpu.matmul %106, %108, %cst_75 {dimension_numbers = #tpu.dot_dimension_numbers<[1], [0], [0], [1], [0, 0, 1, 1], [], []>} : vector<64x128xbf16>, vector<128x128xbf16>, vector<64x128xf32> -> vector<64x128xf32>
    %110 = arith.addf %103, %109 : vector<64x128xf32>
    %111 = arith.index_cast %9 : i32 to index
    %c13 = arith.constant 13 : index
    %c0_76 = arith.constant 0 : index
    %112 = vector.load %arg10[%111, %c13, %c0_76] : memref<2x80x128xbf16, #tpu.memory_space<vmem>>, vector<1x64x128xbf16>
    %113 = vector.shape_cast %112 : vector<1x64x128xbf16> to vector<64x128xbf16>
    %c12_77 = arith.constant 12 : index
    %c0_78 = arith.constant 0 : index
    %c0_79 = arith.constant 0 : index
    %114 = vector.load %arg4[%c12_77, %c0_78, %c0_79] : memref<15x128x128xbf16, #tpu.memory_space<vmem>>, vector<1x128x128xbf16>
    %115 = vector.shape_cast %114 : vector<1x128x128xbf16> to vector<128x128xbf16>
    %cst_80 = arith.constant dense<0.000000e+00> : vector<64x128xf32>
    %116 = tpu.matmul %113, %115, %cst_80 {dimension_numbers = #tpu.dot_dimension_numbers<[1], [0], [0], [1], [0, 0, 1, 1], [], []>} : vector<64x128xbf16>, vector<128x128xbf16>, vector<64x128xf32> -> vector<64x128xf32>
    %117 = arith.addf %110, %116 : vector<64x128xf32>
    %118 = arith.index_cast %9 : i32 to index
    %c14 = arith.constant 14 : index
    %c0_81 = arith.constant 0 : index
    %119 = vector.load %arg10[%118, %c14, %c0_81] : memref<2x80x128xbf16, #tpu.memory_space<vmem>>, vector<1x64x128xbf16>
    %120 = vector.shape_cast %119 : vector<1x64x128xbf16> to vector<64x128xbf16>
    %c13_82 = arith.constant 13 : index
    %c0_83 = arith.constant 0 : index
    %c0_84 = arith.constant 0 : index
    %121 = vector.load %arg4[%c13_82, %c0_83, %c0_84] : memref<15x128x128xbf16, #tpu.memory_space<vmem>>, vector<1x128x128xbf16>
    %122 = vector.shape_cast %121 : vector<1x128x128xbf16> to vector<128x128xbf16>
    %cst_85 = arith.constant dense<0.000000e+00> : vector<64x128xf32>
    %123 = tpu.matmul %120, %122, %cst_85 {dimension_numbers = #tpu.dot_dimension_numbers<[1], [0], [0], [1], [0, 0, 1, 1], [], []>} : vector<64x128xbf16>, vector<128x128xbf16>, vector<64x128xf32> -> vector<64x128xf32>
    %124 = arith.addf %117, %123 : vector<64x128xf32>
    %125 = arith.index_cast %9 : i32 to index
    %c15 = arith.constant 15 : index
    %c0_86 = arith.constant 0 : index
    %126 = vector.load %arg10[%125, %c15, %c0_86] : memref<2x80x128xbf16, #tpu.memory_space<vmem>>, vector<1x64x128xbf16>
    %127 = vector.shape_cast %126 : vector<1x64x128xbf16> to vector<64x128xbf16>
    %c14_87 = arith.constant 14 : index
    %c0_88 = arith.constant 0 : index
    %c0_89 = arith.constant 0 : index
    %128 = vector.load %arg4[%c14_87, %c0_88, %c0_89] : memref<15x128x128xbf16, #tpu.memory_space<vmem>>, vector<1x128x128xbf16>
    %129 = vector.shape_cast %128 : vector<1x128x128xbf16> to vector<128x128xbf16>
    %cst_90 = arith.constant dense<0.000000e+00> : vector<64x128xf32>
    %130 = tpu.matmul %127, %129, %cst_90 {dimension_numbers = #tpu.dot_dimension_numbers<[1], [0], [0], [1], [0, 0, 1, 1], [], []>} : vector<64x128xbf16>, vector<128x128xbf16>, vector<64x128xf32> -> vector<64x128xf32>
    %131 = arith.addf %124, %130 : vector<64x128xf32>
    %c0_91 = arith.constant 0 : index
    %c0_92 = arith.constant 0 : index
    %132 = vector.load %arg6[%c0_91, %c0_92] : memref<1x128xf32, #tpu.memory_space<vmem>>, vector<1x128xf32>
    %133 = vector.broadcast %132 : vector<1x128xf32> to vector<64x128xf32>
    %134 = arith.addf %131, %133 : vector<64x128xf32>
    %cst_93 = arith.constant 0.000000e+00 : f32
    %135 = vector.broadcast %cst_93 : f32 to vector<64x128xf32>
    %136 = arith.maximumf %134, %135 : vector<64x128xf32>
    %137 = arith.truncf %136 : vector<64x128xf32> to vector<64x128xbf16>
    %c0_94 = arith.constant 0 : index
    %c0_95 = arith.constant 0 : index
    %c0_96 = arith.constant 0 : index
    %138 = vector.load %arg8[%c0_94, %c0_95, %c0_96] : memref<1x64x128xbf16, #tpu.memory_space<vmem>>, vector<1x64x128xbf16>
    %139 = vector.shape_cast %138 : vector<1x64x128xbf16> to vector<64x128xbf16>
    %140 = vector.shape_cast %137 : vector<64x128xbf16> to vector<1x64x128xbf16>
    tpu.vector_store %arg8[%c0_94, %c0_95, %c0_96], %140 {strides = array<i32>} : memref<1x64x128xbf16, #tpu.memory_space<vmem>>, vector<1x64x128xbf16>,
    %c0_97 = arith.constant 0 : index
    %c0_98 = arith.constant 0 : index
    %141 = vector.load %arg11[%c0_97, %c0_98] : memref<1x128xf32, #tpu.memory_space<vmem>>, vector<1x128xf32>
    %cst_99 = arith.constant dense<0.000000e+00> : vector<128xf32>
    %142 = vector.multi_reduction <add>, %136, %cst_99 [0] : vector<64x128xf32> to vector<128xf32>
    %143 = vector.shape_cast %142 : vector<128xf32> to vector<1x128xf32>
    %144 = arith.addf %141, %143 : vector<1x128xf32>
    %c0_100 = arith.constant 0 : index
    %c0_101 = arith.constant 0 : index
    %145 = vector.load %arg11[%c0_100, %c0_101] : memref<1x128xf32, #tpu.memory_space<vmem>>, vector<1x128xf32>
    tpu.vector_store %arg11[%c0_100, %c0_101], %144 {strides = array<i32>} : memref<1x128xf32, #tpu.memory_space<vmem>>, vector<1x128xf32>,
    %c0_102 = arith.constant 0 : index
    %c0_103 = arith.constant 0 : index
    %146 = vector.load %arg12[%c0_102, %c0_103] : memref<1x128xf32, #tpu.memory_space<vmem>>, vector<1x128xf32>
    %cst_104 = arith.constant dense<0xFF800000> : vector<128xf32>
    %147 = vector.multi_reduction <maximumf>, %136, %cst_104 [0] : vector<64x128xf32> to vector<128xf32>
    %148 = vector.shape_cast %147 : vector<128xf32> to vector<1x128xf32>
    %149 = arith.maximumf %146, %148 : vector<1x128xf32>
    %c0_105 = arith.constant 0 : index
    %c0_106 = arith.constant 0 : index
    %150 = vector.load %arg12[%c0_105, %c0_106] : memref<1x128xf32, #tpu.memory_space<vmem>>, vector<1x128xf32>
    tpu.vector_store %arg12[%c0_105, %c0_106], %149 {strides = array<i32>} : memref<1x128xf32, #tpu.memory_space<vmem>>, vector<1x128xf32>,
    %c0_i32_107 = arith.constant 0 : i32
    %151 = arith.cmpi eq, %arg1, %c0_i32_107 : i32
    %152 = arith.extui %151 : i1 to i32
    %c0_i32_108 = arith.constant 0 : i32
    %153 = arith.cmpi ne, %152, %c0_i32_108 : i32
    scf.if %153 {
      %c0_109 = arith.constant 0 : index
      %c0_110 = arith.constant 0 : index
      %154 = vector.load %arg11[%c0_109, %c0_110] : memref<1x128xf32, #tpu.memory_space<vmem>>, vector<1x128xf32>
      %cst_111 = arith.constant 1.562500e-02 : f32
      %155 = vector.broadcast %cst_111 : f32 to vector<1x128xf32>
      %156 = arith.mulf %154, %155 : vector<1x128xf32>
      %157 = arith.truncf %156 : vector<1x128xf32> to vector<1x128xbf16>
      %c0_112 = arith.constant 0 : index
      %c0_113 = arith.constant 0 : index
      %158 = vector.load %arg12[%c0_112, %c0_113] : memref<1x128xf32, #tpu.memory_space<vmem>>, vector<1x128xf32>
      %159 = arith.truncf %158 : vector<1x128xf32> to vector<1x128xbf16>
      %c0_114 = arith.constant 0 : index
      %c0_115 = arith.constant 0 : index
      %c0_116 = arith.constant 0 : index
      %160 = vector.load %arg7[%c0_114, %c0_115, %c0_116] : memref<2x128x128xbf16, #tpu.memory_space<vmem>>, vector<1x128x128xbf16>
      %161 = vector.shape_cast %160 : vector<1x128x128xbf16> to vector<128x128xbf16>
      %cst_117 = arith.constant dense<0.000000e+00> : vector<1x128xf32>
      %162 = tpu.matmul %157, %161, %cst_117 {dimension_numbers = #tpu.dot_dimension_numbers<[1], [0], [0], [1], [0, 0, 1, 1], [], []>} : vector<1x128xbf16>, vector<128x128xbf16>, vector<1x128xf32> -> vector<1x128xf32>
      %cst_118 = arith.constant 0.000000e+00 : f32
      %163 = vector.broadcast %cst_118 : f32 to vector<1x128xf32>
      %164 = arith.maximumf %162, %163 : vector<1x128xf32>
      %165 = arith.truncf %164 : vector<1x128xf32> to vector<1x128xbf16>
      %c1_119 = arith.constant 1 : index
      %c0_120 = arith.constant 0 : index
      %c0_121 = arith.constant 0 : index
      %166 = vector.load %arg7[%c1_119, %c0_120, %c0_121] : memref<2x128x128xbf16, #tpu.memory_space<vmem>>, vector<1x128x128xbf16>
      %167 = vector.shape_cast %166 : vector<1x128x128xbf16> to vector<128x128xbf16>
      %cst_122 = arith.constant dense<0.000000e+00> : vector<1x128xf32>
      %168 = tpu.matmul %165, %167, %cst_122 {dimension_numbers = #tpu.dot_dimension_numbers<[1], [0], [0], [1], [0, 0, 1, 1], [], []>} : vector<1x128xbf16>, vector<128x128xbf16>, vector<1x128xf32> -> vector<1x128xf32>
      %c0_123 = arith.constant 0 : index
      %c0_124 = arith.constant 0 : index
      %c0_125 = arith.constant 0 : index
      %169 = vector.load %arg7[%c0_123, %c0_124, %c0_125] : memref<2x128x128xbf16, #tpu.memory_space<vmem>>, vector<1x128x128xbf16>
      %170 = vector.shape_cast %169 : vector<1x128x128xbf16> to vector<128x128xbf16>
      %cst_126 = arith.constant dense<0.000000e+00> : vector<1x128xf32>
      %171 = tpu.matmul %159, %170, %cst_126 {dimension_numbers = #tpu.dot_dimension_numbers<[1], [0], [0], [1], [0, 0, 1, 1], [], []>} : vector<1x128xbf16>, vector<128x128xbf16>, vector<1x128xf32> -> vector<1x128xf32>
      %cst_127 = arith.constant 0.000000e+00 : f32
      %172 = vector.broadcast %cst_127 : f32 to vector<1x128xf32>
      %173 = arith.maximumf %171, %172 : vector<1x128xf32>
      %174 = arith.truncf %173 : vector<1x128xf32> to vector<1x128xbf16>
      %c1_128 = arith.constant 1 : index
      %c0_129 = arith.constant 0 : index
      %c0_130 = arith.constant 0 : index
      %175 = vector.load %arg7[%c1_128, %c0_129, %c0_130] : memref<2x128x128xbf16, #tpu.memory_space<vmem>>, vector<1x128x128xbf16>
      %176 = vector.shape_cast %175 : vector<1x128x128xbf16> to vector<128x128xbf16>
      %cst_131 = arith.constant dense<0.000000e+00> : vector<1x128xf32>
      %177 = tpu.matmul %174, %176, %cst_131 {dimension_numbers = #tpu.dot_dimension_numbers<[1], [0], [0], [1], [0, 0, 1, 1], [], []>} : vector<1x128xbf16>, vector<128x128xbf16>, vector<1x128xf32> -> vector<1x128xf32>
      %178 = arith.addf %168, %177 : vector<1x128xf32>
      %179 = arith.negf %178 : vector<1x128xf32>
      %180 = math.exp %179 : vector<1x128xf32>
      %cst_132 = arith.constant 1.000000e+00 : f32
      %181 = vector.broadcast %cst_132 : f32 to vector<1x128xf32>
      %182 = arith.addf %181, %180 : vector<1x128xf32>
      %183 = arith.divf %181, %182 : vector<1x128xf32>
      %c0_133 = arith.constant 0 : index
      %c0_134 = arith.constant 0 : index
      %c0_135 = arith.constant 0 : index
      %184 = vector.load %arg9[%c0_133, %c0_134, %c0_135] : memref<1x1x128xf32, #tpu.memory_space<vmem>>, vector<1x1x128xf32>
      %185 = vector.shape_cast %184 : vector<1x1x128xf32> to vector<1x128xf32>
      %186 = vector.shape_cast %183 : vector<1x128xf32> to vector<1x1x128xf32>
      tpu.vector_store %arg9[%c0_133, %c0_134, %c0_135], %186 {strides = array<i32>} : memref<1x1x128xf32, #tpu.memory_space<vmem>>, vector<1x1x128xf32>,
    } else {
    }
    return
  }
  func.func @transform_1(%arg0: i32, %arg1: i32) -> (i32, i32, i32) {
    %c0_i32 = arith.constant 0 : i32
    %c0_i32_0 = arith.constant 0 : i32
    return %arg0, %arg1, %c0_i32 : i32, i32, i32
  }
  func.func @transform_2(%arg0: i32, %arg1: i32) -> (i32, i32, i32) {
    %c0_i32 = arith.constant 0 : i32
    %c0_i32_0 = arith.constant 0 : i32
    %c0_i32_1 = arith.constant 0 : i32
    %c0_i32_2 = arith.constant 0 : i32
    return %c0_i32, %c0_i32_0, %c0_i32_1 : i32, i32, i32
  }
  func.func @transform_3(%arg0: i32, %arg1: i32) -> (i32, i32) {
    %c0_i32 = arith.constant 0 : i32
    %c0_i32_0 = arith.constant 0 : i32
    %c0_i32_1 = arith.constant 0 : i32
    return %c0_i32, %c0_i32_0 : i32, i32
  }
  func.func @transform_4(%arg0: i32, %arg1: i32) -> (i32, i32) {
    %c0_i32 = arith.constant 0 : i32
    %c0_i32_0 = arith.constant 0 : i32
    %c0_i32_1 = arith.constant 0 : i32
    return %c0_i32, %c0_i32_0 : i32, i32
  }
  func.func @transform_5(%arg0: i32, %arg1: i32) -> (i32, i32, i32) {
    %c0_i32 = arith.constant 0 : i32
    %c0_i32_0 = arith.constant 0 : i32
    %c0_i32_1 = arith.constant 0 : i32
    %c0_i32_2 = arith.constant 0 : i32
    return %c0_i32, %c0_i32_0, %c0_i32_1 : i32, i32, i32
  }
  func.func @transform_6(%arg0: i32, %arg1: i32) -> (i32, i32, i32) {
    %c0_i32 = arith.constant 0 : i32
    %c0_i32_0 = arith.constant 0 : i32
    return %arg0, %arg1, %c0_i32 : i32, i32, i32
  }
  func.func @transform_7(%arg0: i32, %arg1: i32) -> (i32, i32, i32) {
    %c0_i32 = arith.constant 0 : i32
    %c0_i32_0 = arith.constant 0 : i32
    %c0_i32_1 = arith.constant 0 : i32
    return %arg0, %c0_i32, %c0_i32_0 : i32, i32, i32
  }
}

module attributes {stable_mosaic.version = 11 : i64} {
  func.func @fuse_kernel(%arg0: i32, %arg1: i32, %arg2: memref<1x64x128xbf16, #tpu.memory_space<vmem>>, %arg3: memref<1x1x128xf32, #tpu.memory_space<vmem>>, %arg4: memref<1x64x16xf32, #tpu.memory_space<vmem>>, %arg5: memref<128x128xbf16, #tpu.memory_space<vmem>>, %arg6: memref<1x128xf32, #tpu.memory_space<vmem>>, %arg7: memref<128x16xbf16, #tpu.memory_space<vmem>>, %arg8: memref<1x16xf32, #tpu.memory_space<vmem>>, %arg9: memref<1x64x16xf32, #tpu.memory_space<vmem>>) attributes {dimension_semantics = [#tpu.dimension_semantics<parallel>, #tpu.dimension_semantics<parallel>], iteration_bounds = array<i64: 2, 1>, scalar_prefetch = 0 : i64, scratch_operands = 0 : i64, tpu.core_type = #tpu.core_type<tc>, window_params = [{transform_indices = @transform_0, window_bounds = array<i64: 1, 64, 128>}, {transform_indices = @transform_1, window_bounds = array<i64: 1, 1, 128>}, {transform_indices = @transform_2, window_bounds = array<i64: 1, 64, 16>}, {pipeline_mode = #tpu.pipeline_mode<synchronous>, transform_indices = @transform_3, window_bounds = array<i64: 128, 128>}, {pipeline_mode = #tpu.pipeline_mode<synchronous>, transform_indices = @transform_4, window_bounds = array<i64: 1, 128>}, {pipeline_mode = #tpu.pipeline_mode<synchronous>, transform_indices = @transform_5, window_bounds = array<i64: 128, 16>}, {pipeline_mode = #tpu.pipeline_mode<synchronous>, transform_indices = @transform_6, window_bounds = array<i64: 1, 16>}, {transform_indices = @transform_7, window_bounds = array<i64: 1, 64, 16>}]} {
    %c0 = arith.constant 0 : index
    %c0_0 = arith.constant 0 : index
    %c0_1 = arith.constant 0 : index
    %0 = vector.load %arg2[%c0, %c0_0, %c0_1] : memref<1x64x128xbf16, #tpu.memory_space<vmem>>, vector<1x64x128xbf16>
    %1 = vector.shape_cast %0 : vector<1x64x128xbf16> to vector<64x128xbf16>
    %2 = arith.extf %1 : vector<64x128xbf16> to vector<64x128xf32>
    %c0_2 = arith.constant 0 : index
    %c0_3 = arith.constant 0 : index
    %c0_4 = arith.constant 0 : index
    %3 = vector.load %arg3[%c0_2, %c0_3, %c0_4] : memref<1x1x128xf32, #tpu.memory_space<vmem>>, vector<1x1x128xf32>
    %4 = vector.shape_cast %3 : vector<1x1x128xf32> to vector<1x128xf32>
    %5 = vector.broadcast %4 : vector<1x128xf32> to vector<64x128xf32>
    %6 = arith.mulf %2, %5 : vector<64x128xf32>
    %7 = arith.truncf %6 : vector<64x128xf32> to vector<64x128xbf16>
    %c0_5 = arith.constant 0 : index
    %c0_6 = arith.constant 0 : index
    %8 = vector.load %arg5[%c0_5, %c0_6] : memref<128x128xbf16, #tpu.memory_space<vmem>>, vector<128x128xbf16>
    %cst = arith.constant dense<0.000000e+00> : vector<64x128xf32>
    %9 = tpu.matmul %7, %8, %cst {dimension_numbers = #tpu.dot_dimension_numbers<[1], [0], [0], [1], [0, 0, 1, 1], [], []>} : vector<64x128xbf16>, vector<128x128xbf16>, vector<64x128xf32> -> vector<64x128xf32>
    %c0_7 = arith.constant 0 : index
    %c0_8 = arith.constant 0 : index
    %10 = vector.load %arg6[%c0_7, %c0_8] : memref<1x128xf32, #tpu.memory_space<vmem>>, vector<1x128xf32>
    %11 = vector.broadcast %10 : vector<1x128xf32> to vector<64x128xf32>
    %12 = arith.addf %9, %11 : vector<64x128xf32>
    %cst_9 = arith.constant 0.000000e+00 : f32
    %13 = vector.broadcast %cst_9 : f32 to vector<64x128xf32>
    %14 = arith.maximumf %12, %13 : vector<64x128xf32>
    %15 = arith.truncf %14 : vector<64x128xf32> to vector<64x128xbf16>
    %c0_10 = arith.constant 0 : index
    %c0_11 = arith.constant 0 : index
    %16 = vector.load %arg7[%c0_10, %c0_11] : memref<128x16xbf16, #tpu.memory_space<vmem>>, vector<128x16xbf16>
    %cst_12 = arith.constant dense<0.000000e+00> : vector<64x16xf32>
    %17 = tpu.matmul %15, %16, %cst_12 {dimension_numbers = #tpu.dot_dimension_numbers<[1], [0], [0], [1], [0, 0, 1, 1], [], []>} : vector<64x128xbf16>, vector<128x16xbf16>, vector<64x16xf32> -> vector<64x16xf32>
    %c0_13 = arith.constant 0 : index
    %c0_14 = arith.constant 0 : index
    %18 = vector.load %arg8[%c0_13, %c0_14] : memref<1x16xf32, #tpu.memory_space<vmem>>, vector<1x16xf32>
    %19 = vector.broadcast %18 : vector<1x16xf32> to vector<64x16xf32>
    %20 = arith.addf %17, %19 : vector<64x16xf32>
    %c0_15 = arith.constant 0 : index
    %c0_16 = arith.constant 0 : index
    %c0_17 = arith.constant 0 : index
    %21 = vector.load %arg4[%c0_15, %c0_16, %c0_17] : memref<1x64x16xf32, #tpu.memory_space<vmem>>, vector<1x64x16xf32>
    %22 = vector.shape_cast %21 : vector<1x64x16xf32> to vector<64x16xf32>
    %23 = arith.addf %20, %22 : vector<64x16xf32>
    %cst_18 = arith.constant 0.000000e+00 : f32
    %24 = vector.broadcast %cst_18 : f32 to vector<64x16xf32>
    %25 = arith.maximumf %23, %24 : vector<64x16xf32>
    %c0_19 = arith.constant 0 : index
    %c0_20 = arith.constant 0 : index
    %c0_21 = arith.constant 0 : index
    %26 = vector.load %arg9[%c0_19, %c0_20, %c0_21] : memref<1x64x16xf32, #tpu.memory_space<vmem>>, vector<1x64x16xf32>
    %27 = vector.shape_cast %26 : vector<1x64x16xf32> to vector<64x16xf32>
    %28 = vector.shape_cast %25 : vector<64x16xf32> to vector<1x64x16xf32>
    tpu.vector_store %arg9[%c0_19, %c0_20, %c0_21], %28 {strides = array<i32>} : memref<1x64x16xf32, #tpu.memory_space<vmem>>, vector<1x64x16xf32>,
    return
  }
  func.func @transform_0(%arg0: i32, %arg1: i32) -> (i32, i32, i32) {
    %c0_i32 = arith.constant 0 : i32
    %c0_i32_0 = arith.constant 0 : i32
    return %arg0, %arg1, %c0_i32 : i32, i32, i32
  }
  func.func @transform_1(%arg0: i32, %arg1: i32) -> (i32, i32, i32) {
    %c0_i32 = arith.constant 0 : i32
    %c0_i32_0 = arith.constant 0 : i32
    %c0_i32_1 = arith.constant 0 : i32
    return %arg0, %c0_i32, %c0_i32_0 : i32, i32, i32
  }
  func.func @transform_2(%arg0: i32, %arg1: i32) -> (i32, i32, i32) {
    %c0_i32 = arith.constant 0 : i32
    %c0_i32_0 = arith.constant 0 : i32
    return %arg0, %arg1, %c0_i32 : i32, i32, i32
  }
  func.func @transform_3(%arg0: i32, %arg1: i32) -> (i32, i32) {
    %c0_i32 = arith.constant 0 : i32
    %c0_i32_0 = arith.constant 0 : i32
    %c0_i32_1 = arith.constant 0 : i32
    return %c0_i32, %c0_i32_0 : i32, i32
  }
  func.func @transform_4(%arg0: i32, %arg1: i32) -> (i32, i32) {
    %c0_i32 = arith.constant 0 : i32
    %c0_i32_0 = arith.constant 0 : i32
    %c0_i32_1 = arith.constant 0 : i32
    return %c0_i32, %c0_i32_0 : i32, i32
  }
  func.func @transform_5(%arg0: i32, %arg1: i32) -> (i32, i32) {
    %c0_i32 = arith.constant 0 : i32
    %c0_i32_0 = arith.constant 0 : i32
    %c0_i32_1 = arith.constant 0 : i32
    return %c0_i32, %c0_i32_0 : i32, i32
  }
  func.func @transform_6(%arg0: i32, %arg1: i32) -> (i32, i32) {
    %c0_i32 = arith.constant 0 : i32
    %c0_i32_0 = arith.constant 0 : i32
    %c0_i32_1 = arith.constant 0 : i32
    return %c0_i32, %c0_i32_0 : i32, i32
  }
  func.func @transform_7(%arg0: i32, %arg1: i32) -> (i32, i32, i32) {
    %c0_i32 = arith.constant 0 : i32
    %c0_i32_0 = arith.constant 0 : i32
    return %arg0, %arg1, %c0_i32 : i32, i32, i32
  }
}

</mosaic_0001>

<bundles_post_ra>
// kernel: reverse.0
= control target key start
LH: loop header
LB: loop body
LE: loop exit
PB: predicated region body
PF: predicated region fallthrough
CT: control target
= control target key end

     0   :  { %v2_v0 = vlaneseq  ;;  %s162_s0 = inlined_call_operand.vmem [shape: f32[2,16,31], index: 0, kind: input, shape index: {}]   ;;  %s163_s1 = inlined_call_operand.vmem [shape: f32[2,16,31], index: 1, kind: output, shape index: {}]  }
   0x1   :  { %v43_v2 = vld [vmem:[%s162_s0 + $0x10] sm:$0xff]  ;;  %v39_v3 = vld [vmem:[%s162_s0] sm:$0xff]  ;;  %v45_v4 = vld [vmem:[%s162_s0 + $0x18] sm:$0xff] }
   0x2   :  { %v3_v1 = vsub.s32 30, %v2_v0  ;;  %v41_v5 = vld [vmem:[%s162_s0 + $0x8] sm:$0xff] }
   0x4   :  { %4 = vset.pattern.permute.xlu0 %v3_v1  ;;  %127 = vset.pattern.permute.xlu1 %v3_v1 }
   0x5   :  { %63 = vperm.xlu1 %127, %v43_v2   ;;  %51 = vperm.xlu0 %4, %v39_v3  }
   0xd   :  { %69 = vperm.xlu1 %127, %v45_v4   ;;  %57 = vperm.xlu0 %4, %v41_v5  }
  0x77   :  { %v64_v6 = vpop.permute.xlu1 %63  ;;  %v52_v7 = vpop.permute.xlu0 %51 }
  0x78   :  { %111 = vst [vmem:[%s163_s1 + $0x10] sm:$0xff] %v64_v6 }
  0x79   :  { %107 = vst [vmem:[%s163_s1] sm:$0xff] %v52_v7 }
  0x7f   :  { %v70_v8 = vpop.permute.xlu1 %69  ;;  %v58_v9 = vpop.permute.xlu0 %57 }
  0x80   :  { %113 = vst [vmem:[%s163_s1 + $0x18] sm:$0xff] %v70_v8 }
  0x81   :  { %109 = vst [vmem:[%s163_s1 + $0x8] sm:$0xff] %v58_v9 }

// kernel: msh_forward.3
= control target key start
LH: loop header
LB: loop body
LE: loop exit
PB: predicated region body
PF: predicated region fallthrough
CT: control target
= control target key end

     0   :  { %s975_s24 = smov 0   ;;  %s977_s25 = smov 0   ;;  %s1107_s0 = inlined_call_operand.vmem [shape: bf16[2,64,128], index: 0, kind: input, shape index: {}]   ;;  %s1108_s1 = inlined_call_operand.vmem [shape: f32[2,1,128], index: 1, kind: input, shape index: {}]   ;;  %s1109_s2 = inlined_call_operand.vmem [shape: f32[2,64,16], index: 2, kind: input, shape index: {}]   ;;  %s1110_s3 = inlined_call_operand.vmem [shape: bf16[128,128], index: 3, kind: input, shape index: {}]   ;;  %s1111_s4 = inlined_call_operand.vmem [shape: f32[1,128], index: 4, kind: input, shape index: {}]   ;;  %s1112_s5 = inlined_call_operand.vmem [shape: bf16[128,16], index: 5, kind: input, shape index: {}]   ;;  %s1113_s6 = inlined_call_operand.vmem [shape: f32[1,16], index: 6, kind: input, shape index: {}]   ;;  %s1114_s7 = inlined_call_operand.vmem [shape: f32[2,64,16], index: 7, kind: output, shape index: {}]  }
   0x1   :  { %s979_s26 = smov 0  }
   0x2 LB: > { %s29_s27 = sadd.s32 1, %s929_s25  ;;  %p757_p0 = scmp.ge.s32.totalorder %s933_s26, 1  ;;  %s933_s26 = sphi %s979_s26, %s17_s26   ;;  %s929_s25 = sphi %s977_s25, %s1116_s25   ;;  %s925_s24 = sphi %s975_s24, %s1115_s24  }
   0x3   : > { %p31_p1 = scmp.ge.s32.totalorder %s29_s27, 2  ;;  %p283_p2 = scmp.lt.s32.totalorder %s933_s26, 3 }
   0x5   : > { %s1118_s27 = smov (%p31_p1, %s29_s27), 0  ;;  %p284_p3 = pnand %p757_p0, %p283_p2 }
   0x6   : > { %p336_p4 = scmp.lt.s32.totalorder (!%p284_p3), %s925_s24, 1 }
   0x7   : > { %287 = sbr.rel (%p284_p3) target bundleno = 353 (0x161), region = 48 }
   0xc   : > { %v840_v0 = vld [vmem:[%s1110_s3 + $0x38] sm:$0xff]  ;;  %v839_v1 = vld [vmem:[%s1110_s3 + $0x30] sm:$0xff]  ;;  %s1120_s24 = smov (!%p336_p4, %s925_s24), 1  ;;  %v838_v2 = vld [vmem:[%s1110_s3 + $0x28] sm:$0xff]  ;;  %vm630_vm0 = vcmask 130048  }
   0xd   : > { %468 = vmatpush.bf16.msra.mxu0 %v840_v0  ;;  %868 = vmatpush.bf16.msra.mxu2 %v840_v0  ;;  %s347_s11 = scalar_lea.vmem %s1108_s1, %s1120_s24  ;;  %v837_v3 = vld [vmem:[%s1110_s3 + $0x20] sm:$0xff]  ;;  %s830_s16 = sshll.u32 %s1120_s24, 5  ;;  %v836_v4 = vld [vmem:[%s1110_s3 + $0x18] sm:$0xff]  ;;  %v835_v6 = vld [vmem:[%s1110_s3 + $0x10] sm:$0xff] }
   0xe   : > { %s1018_s21 = scalar_lea.vmem %s1107_s0, %s830_s16  ;;  %v848_v5 = vld [vmem:[%s1112_s5 + $0x38] sm:$0xff]  ;;  %v847_v9 = vld [vmem:[%s1112_s5 + $0x30] sm:$0xff]  ;;  %v908_v12 = vld [vmem:[%s347_s11] ss:$0 sm:$0xff]  ;;  %s831_s8 = sshll.u32 %s1120_s24, 6 }
   0xf   : > { %v850_v7 = vld [vmem:[%s1018_s21] sm:$0xff]   ;;  %v866_v8 = vld [vmem:[%s1018_s21 + $0x10] sm:$0xff]   ;;  %577 = vmatpush.bf16.msra.mxu1 %v848_v5  ;;  %876 = vmatpush.bf16.msra.mxu3 %v848_v5  ;;  %v834_v15 = vld [vmem:[%s1110_s3 + $0x8] sm:$0xff]  ;;  %s1064_s12 = scalar_lea.vmem %s1109_s2, %s831_s8  ;;  %s1073_s24 = scalar_lea.vmem %s1114_s7, %s831_s8 }
  0x10   : > { %v851_v10 = vunpack.c.l.bf16 %v850_v7  ;;  %v852_v11 = vunpack.c.h.bf16 %v850_v7  ;;  %v859_v13 = vunpack.c.l.bf16 %v866_v8  ;;  %v860_v14 = vunpack.c.h.bf16 %v866_v8  ;;  %v846_v16 = vld [vmem:[%s1112_s5 + $0x28] sm:$0xff]  ;;  %v833_v21 = vld [vmem:[%s1110_s3] sm:$0xff]  ;;  %v867_v26 = vld [vmem:[%s1018_s21 + $0x18] sm:$0xff]  }
  0x11   : > { %469 = vmatpush.bf16.msra.mxu0 %v839_v1  ;;  %869 = vmatpush.bf16.msra.mxu2 %v839_v1  ;;  %v845_v22 = vld [vmem:[%s1112_s5 + $0x20] sm:$0xff]  ;;  %v865_v25 = vld [vmem:[%s1018_s21 + $0x8] sm:$0xff]   ;;  %v863_v29 = vunpack.c.l.bf16 %v867_v26  ;;  %v864_v30 = vunpack.c.h.bf16 %v867_v26  ;;  %v844_v37 = vld [vmem:[%s1112_s5 + $0x18] sm:$0xff] }
  0x12   : > { %v388_v17 = vmul.f32 %v908_v12, %v851_v10  ;;  %v389_v18 = vmul.f32 %v908_v12, %v852_v11  ;;  %v392_v19 = vmul.f32 %v908_v12, %v859_v13  ;;  %v393_v20 = vmul.f32 %v908_v12, %v860_v14  ;;  %v843_v38 = vld [vmem:[%s1112_s5 + $0x10] sm:$0xff]  ;;  %v842_v39 = vld [vmem:[%s1112_s5 + $0x8] sm:$0xff]  ;;  %v841_v40 = vld [vmem:[%s1112_s5] sm:$0xff] }
  0x13   : > { %578 = vmatpush.bf16.msra.mxu1 %v847_v9  ;;  %877 = vmatpush.bf16.msra.mxu3 %v847_v9  ;;  %v855_v27 = vunpack.c.l.bf16 %v865_v25  ;;  %v856_v28 = vunpack.c.h.bf16 %v865_v25  ;;  %v394_v33 = vmul.f32 %v908_v12, %v863_v29  ;;  %v395_v34 = vmul.f32 %v908_v12, %v864_v30  ;;  %v909_v42 = vld [vmem:[%s1111_s4] ss:$0 sm:$0xff]  ;;  %v607_v13 = vld [vmem:[%s1064_s12 + $0x8] sm:$0xff] }
  0x14   : > { %v396_v23 = vpack.c.bf16 %v389_v18, %v388_v17  ;;  %v398_v24 = vpack.c.bf16 %v393_v20, %v392_v19  ;;  %v606_v8 = vld [vmem:[%s1064_s12] sm:$0xff] }
  0x15   : > { %470 = vmatpush.bf16.msra.mxu0 %v838_v2  ;;  %870 = vmatpush.bf16.msra.mxu2 %v838_v2  ;;  %v390_v31 = vmul.f32 %v908_v12, %v855_v27  ;;  %v391_v32 = vmul.f32 %v908_v12, %v856_v28  ;;  %v399_v36 = vpack.c.bf16 %v395_v34, %v394_v33  ;;  %v610_v17 = vld [vmem:[%s1064_s12 + $0x20] sm:$0xff]  ;;  %v611_v27 = vld [vmem:[%s1064_s12 + $0x28] sm:$0xff] }
  0x17   : > { %579 = vmatpush.bf16.msra.mxu1 %v846_v16  ;;  %878 = vmatpush.bf16.msra.mxu3 %v846_v16  ;;  %v397_v35 = vpack.c.bf16 %v391_v32, %v390_v31  ;;  %v609_v32 = vld [vmem:[%s1064_s12 + $0x18] sm:$0xff] }
  0x19   : > { %471 = vmatpush.bf16.msra.mxu0 %v837_v3  ;;  %871 = vmatpush.bf16.msra.mxu2 %v837_v3 }
  0x1b   : > { %580 = vmatpush.bf16.msra.mxu1 %v845_v22  ;;  %879 = vmatpush.bf16.msra.mxu3 %v845_v22  ;;  %v608_v22 = vld [vmem:[%s1064_s12 + $0x10] sm:$0xff] }
  0x1d   : > { %472 = vmatpush.bf16.msra.mxu0 %v836_v4  ;;  %872 = vmatpush.bf16.msra.mxu2 %v836_v4 }
  0x1f   : > { %581 = vmatpush.bf16.msra.mxu1 %v844_v37  ;;  %880 = vmatpush.bf16.msra.mxu3 %v844_v37  ;;  %v612_v37 = vld [vmem:[%s1064_s12 + $0x30] sm:$0xff] }
  0x21   : > { %473 = vmatpush.bf16.msra.mxu0 %v835_v6  ;;  %873 = vmatpush.bf16.msra.mxu2 %v835_v6  ;;  %v910_v6 = vld [vmem:[%s1113_s6] ss:$0 sm:$0xff] }
  0x23   : > { %582 = vmatpush.bf16.msra.mxu1 %v843_v38  ;;  %881 = vmatpush.bf16.msra.mxu3 %v843_v38 }
  0x25   : > { %474 = vmatpush.bf16.msra.mxu0 %v834_v15  ;;  %874 = vmatpush.bf16.msra.mxu2 %v834_v15 }
  0x27   : > { %583 = vmatpush.bf16.msra.mxu1 %v842_v39  ;;  %882 = vmatpush.bf16.msra.mxu3 %v842_v39 }
  0x29   : > { %475 = vmatpush.bf16.msra.mxu0 %v833_v21  ;;  %875 = vmatpush.bf16.msra.mxu2 %v833_v21 }
  0x2b   : > { %584 = vmatpush.bf16.msra.mxu1 %v841_v40  ;;  %883 = vmatpush.bf16.msra.mxu3 %v841_v40 }
  0x2c   : > { %476 = vmatmul.bf16.vlgmr.msra.gmra.mxu0 %v396_v23  ;;  %486 = vmatmul.bf16.vlgmr.msra.gmra.mxu2 %v398_v24 }
  0x3c   : > { %481 = vmatmul.bf16.gmra.mxu0 %v397_v35  ;;  %491 = vmatmul.bf16.gmra.mxu2 %v399_v36 }
  0xa9   : > { %v477_v41 = vpop.f32.mrf.mxu0 }
  0xaa   : > { %v478_v43 = vadd.f32 %v909_v42, %v477_v41 }
  0xac   : > { %v497_v46 = vmax.f32 %v478_v43, 0.0  ;;  %v613_v43 = vld [vmem:[%s1064_s12 + $0x38] sm:$0xff] }
  0xaf   : > { %v487_v44 = vpop.f32.mrf.mxu2 }
  0xb0   : > { %v488_v49 = vadd.f32 %v909_v42, %v487_v44 }
  0xb1   : > { %v479_v45 = vpop.f32.mrf.mxu0 }
  0xb2   : > { %v480_v47 = vadd.f32 %v909_v42, %v479_v45  ;;  %v501_v54 = vmax.f32 %v488_v49, 0.0 }
  0xb4   : > { %v498_v48 = vmax.f32 %v480_v47, 0.0 }
  0xb6   : > { %v505_v50 = vpack.c.bf16 %v498_v48, %v497_v46 }
  0xb7   : > { %v489_v51 = vpop.f32.mrf.mxu2 }
  0xb8   : > { %v490_v52 = vadd.f32 %v909_v42, %v489_v51  ;;  %585 = vmatmul.bf16.vlgmr.msra.gmra.mxu1 %v505_v50 }
  0xb9   : > { %v482_v53 = vpop.f32.mrf.mxu0 }
  0xba   : > { %v502_v55 = vmax.f32 %v490_v52, 0.0  ;;  %v483_v57 = vadd.f32 %v909_v42, %v482_v53 }
  0xbc   : > { %v507_v56 = vpack.c.bf16 %v502_v55, %v501_v54  ;;  %v499_v60 = vmax.f32 %v483_v57, 0.0 }
  0xbe   : > { %595 = vmatmul.bf16.vlgmr.msra.gmra.mxu3 %v507_v56 }
  0xbf   : > { %v492_v58 = vpop.f32.mrf.mxu2 }
  0xc0   : > { %v493_v63 = vadd.f32 %v909_v42, %v492_v58 }
  0xc1   : > { %v484_v59 = vpop.f32.mrf.mxu0 }
  0xc2   : > { %v485_v61 = vadd.f32 %v909_v42, %v484_v59  ;;  %v503_v3 = vmax.f32 %v493_v63, 0.0 }
  0xc4   : > { %v500_v62 = vmax.f32 %v485_v61, 0.0 }
  0xc6   : > { %v506_v0 = vpack.c.bf16 %v500_v62, %v499_v60 }
  0xc7   : > { %v494_v1 = vpop.f32.mrf.mxu2 }
  0xc8   : > { %v495_v2 = vadd.f32 %v909_v42, %v494_v1  ;;  %590 = vmatmul.bf16.gmra.mxu1 %v506_v0 }
  0xca   : > { %v504_v4 = vmax.f32 %v495_v2, 0.0 }
  0xcc   : > { %v508_v5 = vpack.c.bf16 %v504_v4, %v503_v3 }
  0xce   : > { %600 = vmatmul.bf16.gmra.mxu3 %v508_v5 }
 0x135   : > { %v586_v7 = vpop.f32.mrf.mxu1 }
 0x136   : > { %v587_v9 = vadd.f32 %v910_v6, %v586_v7 }
 0x138   : > { %v614_v10 = vadd.f32 %v606_v8, %v587_v9 }
 0x13a   : > { %v622_v11 = vmax.f32 %v614_v10, 0.0 }
 0x13c   : > { %631 = vst.msk [vmem:[%s1073_s24] sm:$0xff] %vm630_vm0, %v622_v11 }
 0x13d   : > { %v588_v12 = vpop.f32.mrf.mxu1 }
 0x13e   : > { %v589_v14 = vadd.f32 %v910_v6, %v588_v12 }
 0x140   : > { %v615_v15 = vadd.f32 %v607_v13, %v589_v14 }
 0x141   : > { %v596_v16 = vpop.f32.mrf.mxu3 }
 0x142   : > { %v623_v18 = vmax.f32 %v615_v15, 0.0  ;;  %v597_v19 = vadd.f32 %v910_v6, %v596_v16 }
 0x144   : > { %632 = vst.msk [vmem:[%s1073_s24 + $0x8] sm:$0xff] %vm630_vm0, %v623_v18  ;;  %v618_v20 = vadd.f32 %v610_v17, %v597_v19 }
 0x145   : > { %v591_v21 = vpop.f32.mrf.mxu1 }
 0x146   : > { %v626_v23 = vmax.f32 %v618_v20, 0.0  ;;  %v592_v24 = vadd.f32 %v910_v6, %v591_v21 }
 0x148   : > { %635 = vst.msk [vmem:[%s1073_s24 + $0x20] sm:$0xff] %vm630_vm0, %v626_v23  ;;  %v616_v25 = vadd.f32 %v608_v22, %v592_v24 }
 0x149   : > { %v598_v26 = vpop.f32.mrf.mxu3 }
 0x14a   : > { %v624_v28 = vmax.f32 %v616_v25, 0.0  ;;  %v599_v29 = vadd.f32 %v910_v6, %v598_v26 }
 0x14c   : > { %633 = vst.msk [vmem:[%s1073_s24 + $0x10] sm:$0xff] %vm630_vm0, %v624_v28  ;;  %v619_v30 = vadd.f32 %v611_v27, %v599_v29 }
 0x14d   : > { %v593_v31 = vpop.f32.mrf.mxu1 }
 0x14e   : > { %v627_v33 = vmax.f32 %v619_v30, 0.0  ;;  %v594_v34 = vadd.f32 %v910_v6, %v593_v31 }
 0x150   : > { %636 = vst.msk [vmem:[%s1073_s24 + $0x28] sm:$0xff] %vm630_vm0, %v627_v33  ;;  %v617_v35 = vadd.f32 %v609_v32, %v594_v34 }
 0x151   : > { %v601_v36 = vpop.f32.mrf.mxu3 }
 0x152   : > { %v625_v38 = vmax.f32 %v617_v35, 0.0  ;;  %v602_v39 = vadd.f32 %v910_v6, %v601_v36 }
 0x154   : > { %634 = vst.msk [vmem:[%s1073_s24 + $0x18] sm:$0xff] %vm630_vm0, %v625_v38  ;;  %v620_v40 = vadd.f32 %v612_v37, %v602_v39 }
 0x156   : > { %v628_v41 = vmax.f32 %v620_v40, 0.0 }
 0x158   : > { %637 = vst.msk [vmem:[%s1073_s24 + $0x30] sm:$0xff] %vm630_vm0, %v628_v41 }
 0x159   : > { %v603_v42 = vpop.f32.mrf.mxu3 }
 0x15a   : > { %v604_v44 = vadd.f32 %v910_v6, %v603_v42 }
 0x15c   : > { %v621_v45 = vadd.f32 %v613_v43, %v604_v44 }
 0x15e   : > { %v629_v46 = vmax.f32 %v621_v45, 0.0 }
 0x160   : > { %638 = vst.msk [vmem:[%s1073_s24 + $0x38] sm:$0xff] %vm630_vm0, %v629_v46 }
 0x161 PF: > { %s17_s26 = sadd.s32 1, %s933_s26   ;;  %s1115_s24 = smov %s929_s25 }
 0x162   : > { %p14_p5 = scmp.ge.s32.totalorder %s17_s26, 4   ;;  %s1116_s25 = smov %s1118_s27 }
 0x164   :  { %16 = sbr.rel (!%p14_p5) target bundleno = 2 (0x2), region = 84 }

// kernel: msh_forward.2
= control target key start
LH: loop header
LB: loop body
LE: loop exit
PB: predicated region body
PF: predicated region fallthrough
CT: control target
= control target key end

     0   :  { %s4143_s24 = smov 0   ;;  %s4145_s25 = smov 0   ;;  %s5054_s0 = inlined_call_operand.vmem [shape: bf16[2,80,128], index: 0, kind: input, shape index: {}]   ;;  %s5055_s1 = inlined_call_operand.vmem [shape: bf16[2,64,128], index: 1, kind: input, shape index: {}]   ;;  %s5056_s2 = inlined_call_operand.vmem [shape: bf16[15,128,128], index: 2, kind: input, shape index: {}]   ;;  %s5057_s3 = inlined_call_operand.vmem [shape: bf16[128,128], index: 3, kind: input, shape index: {}]   ;;  %s5058_s4 = inlined_call_operand.vmem [shape: f32[1,128], index: 4, kind: input, shape index: {}]   ;;  %s5059_s5 = inlined_call_operand.vmem [shape: bf16[2,128,128], index: 5, kind: input, shape index: {}]   ;;  %s5060_s6 = inlined_call_operand.vmem [shape: bf16[2,64,128], index: 6, kind: output, shape index: {0}]   ;;  %s5061_s7 = inlined_call_operand.vmem [shape: f32[2,1,128], index: 7, kind: output, shape index: {1}]  }
   0x1   :  { %s4147_s26 = smov 0  }
   0x2 LB: > { %s30_s27 = sadd.s32 1, %s4095_s25  ;;  %p2971_p0 = scmp.ge.s32.totalorder %s4099_s26, 1  ;;  %s4099_s26 = sphi %s4147_s26, %s18_s26   ;;  %s4095_s25 = sphi %s4145_s25, %s5063_s25   ;;  %s4091_s24 = sphi %s4143_s24, %s5062_s24  }
   0x3   : > { %p32_p1 = scmp.ge.s32.totalorder %s30_s27, 2  ;;  %p237_p2 = scmp.lt.s32.totalorder %s4099_s26, 3 }
   0x5   : > { %s5065_s27 = smov (%p32_p1, %s30_s27), 0  ;;  %p238_p3 = pnand %p2971_p0, %p237_p2 }
   0x6   : > { %p279_p4 = scmp.lt.s32.totalorder (!%p238_p3), %s4091_s24, 1  ;;  %s3834_s28 = smul.u32 (!%p238_p3), 40, %s4091_s24 }
   0x7   : > { %241 = sbr.rel (%p238_p3) target bundleno = 776 (0x308), region = 40 }
   0x8   : > { %s325_s8 = scalar_lea.vmem (!%p238_p3), %s5054_s0, %s3834_s28 }
   0xc   : > { %v4101_v0 = vmov 0.0   ;;  %s5067_s24 = smov (!%p279_p4, %s4091_s24), 1  ;;  %v4102_v1 = vmov -inf   ;;  %v340_v2 = vld [vmem:[%s325_s8] sm:$0xff]  ;;  %v342_v3 = vld [vmem:[%s325_s8 + $0x8] sm:$0xff]  ;;  %v344_v4 = vld [vmem:[%s325_s8 + $0x10] sm:$0xff] }
   0xd   : > { %317 = vst [vmem:[#allocation3] sm:$0x1] %v4101_v0  ;;  %s3832_s9 = sshll.u32 %s5067_s24, 5  ;;  %s300_s12 = scalar_lea.vmem %s5061_s7, %s5067_s24  ;;  %v346_v5 = vld [vmem:[%s325_s8 + $0x18] sm:$0xff]  ;;  %v348_v6 = vld [vmem:[%s325_s8 + $0x20] sm:$0xff] }
   0xe   : > { %318 = vst [vmem:[#allocation4] sm:$0x1] %v4102_v1  ;;  %s286_s15 = scalar_lea.vmem %s5055_s1, %s3832_s9  ;;  %s4177_s18 = scalar_lea.vmem %s5060_s6, %s3832_s9 }
   0xf   : > { %341 = vst [vmem:[#allocation2] sm:$0xff] %v340_v2 }
  0x10   : > { %343 = vst [vmem:[#allocation2 + $0x8] sm:$0xff] %v342_v3 }
  0x11   : > { %345 = vst [vmem:[#allocation2 + $0x10] sm:$0xff] %v344_v4 }
  0x12   : > { %347 = vst [vmem:[#allocation2 + $0x18] sm:$0xff] %v346_v5 }
  0x13   : > { %349 = vst [vmem:[#allocation2 + $0x20] sm:$0xff] %v348_v6 }
  0x14   : > { %355 = vsyncadd [#allocation5], 640  ;;  %v4179_v7 = vld [vmem:[%s286_s15] sm:$0xf]  ;;  %v4181_v8 = vld [vmem:[%s286_s15] sm:$0xf0] }
  0x15   : > { %v4183_v9 = vld [vmem:[%s286_s15 + $0x8] sm:$0xf]  ;;  %v4185_v10 = vld [vmem:[%s286_s15 + $0x8] sm:$0xf0]  ;;  %v4187_v11 = vld [vmem:[%s286_s15 + $0x10] sm:$0xf] }
  0x16   : > { %v4189_v12 = vld [vmem:[%s286_s15 + $0x10] sm:$0xf0]  ;;  %v4191_v13 = vld [vmem:[%s286_s15 + $0x18] sm:$0xf]  ;;  %v4193_v14 = vld [vmem:[%s286_s15 + $0x18] sm:$0xf0] }
  0x17   : > { %v4198_v15 = vld [vmem:[%s5057_s3] sm:$0xf]  ;;  %v4203_v16 = vld [vmem:[%s5057_s3] sm:$0xf0]  ;;  %v4208_v17 = vld [vmem:[%s5057_s3 + $0x8] sm:$0xf] }
  0x18   : > { %v4213_v18 = vld [vmem:[%s5057_s3 + $0x8] sm:$0xf0]  ;;  %v3041_v19 = vld [vmem:[%s5057_s3 + $0x10] sm:$0xf]  ;;  %v3843_v20 = vld [vmem:[%s5057_s3 + $0x10] sm:$0xf0] }
  0x19   : > { %v3045_v21 = vld [vmem:[%s5057_s3 + $0x18] sm:$0xf]  ;;  %v3844_v22 = vld [vmem:[%s5057_s3 + $0x18] sm:$0xf0]  ;;  %v3049_v23 = vld [vmem:[%s5057_s3 + $0x20] sm:$0xf] }
  0x1a   : > { %v3845_v24 = vld [vmem:[%s5057_s3 + $0x20] sm:$0xf0]  ;;  %v3053_v25 = vld [vmem:[%s5057_s3 + $0x28] sm:$0xf]  ;;  %v3846_v26 = vld [vmem:[%s5057_s3 + $0x28] sm:$0xf0] }
  0x1b   : > { %v3057_v27 = vld [vmem:[%s5057_s3 + $0x30] sm:$0xf]  ;;  %v3847_v28 = vld [vmem:[%s5057_s3 + $0x30] sm:$0xf0]  ;;  %v3061_v29 = vld [vmem:[%s5057_s3 + $0x38] sm:$0xf] }
  0x1c   : > { %v3848_v30 = vld [vmem:[%s5057_s3 + $0x38] sm:$0xf0] }
  0x1d   : > { %4087 = dma.done.wait [#allocation5], 640 }
  0x1e   : > { %4088 = vsyncadd [#allocation5], 4294966656  ;;  %v3062_v31 = vor.u32 %v3848_v30, %v3061_v29  ;;  %v3058_v32 = vor.u32 %v3847_v28, %v3057_v27  ;;  %v3054_v33 = vor.u32 %v3846_v26, %v3053_v25  ;;  %v3856_v34 = vld [vmem:[%s5056_s2 + $0x38] sm:$0xff]  ;;  %v3855_v37 = vld [vmem:[%s5056_s2 + $0x30] sm:$0xff]  ;;  %v3050_v40 = vor.u32 %v3845_v24, %v3049_v23 }
  0x1f   : > { %v3864_v35 = vld [vmem:[%s5056_s2 + $0x78] sm:$0xff]  ;;  %568 = vmatpush.bf16.msra.mxu0 %v3856_v34  ;;  %v3863_v38 = vld [vmem:[%s5056_s2 + $0x70] sm:$0xff]  ;;  %v3854_v41 = vld [vmem:[%s5056_s2 + $0x28] sm:$0xff]  ;;  %v3046_v44 = vor.u32 %v3844_v22, %v3045_v21  ;;  %v3042_v50 = vor.u32 %v3843_v20, %v3041_v19  ;;  %v3038_v56 = vor.u32 %v4213_v18, %v4208_v17  ;;  %v3034_v61 = vor.u32 %v4203_v16, %v4198_v15 }
  0x20   : > { %669 = vmatpush.bf16.msra.mxu1 %v3062_v31  ;;  %v3872_v36 = vld [vmem:[%s5056_s2 + $0xb8] sm:$0xff]  ;;  %781 = vmatpush.bf16.msra.mxu2 %v3864_v35  ;;  %v3871_v39 = vld [vmem:[%s5056_s2 + $0xb0] sm:$0xff]  ;;  %v3862_v42 = vld [vmem:[%s5056_s2 + $0x68] sm:$0xff]  ;;  %v3018_v15 = vor.u32 %v4181_v8, %v4179_v7  ;;  %vm479_vm0 = vsmask.f32 7424  ;;  %vm719_vm1 = vcmask 1046528  }
  0x21   : > { %921 = vmatpush.bf16.msra.mxu3 %v3872_v36  ;;  %v3870_v43 = vld [vmem:[%s5056_s2 + $0xa8] sm:$0xff]  ;;  %v3989_v45 = vld [vmem:[#allocation2] sm:$0xff]   ;;  %v3852_v53 = vld [vmem:[%s5056_s2 + $0x18] sm:$0xff]  ;;  %vm839_vm2 = vsmask.f32 6400  ;;  %vm979_vm5 = vcmask 1045504  }
  0x22   : > { %v698_v46 = vld [vmem:[#allocation2] sm:$0xe]  ;;  %v4287_v51 = vunpack.c.h.b16 %v3989_v45  ;;  %v3860_v54 = vld [vmem:[%s5056_s2 + $0x58] sm:$0xff]  ;;  %v4301_v58 = vld [vmem:[#allocation2 + $0x8] sm:$0xff]   ;;  %v483_v62 = vshll.u32 %v3989_v45, 16  ;;  %v481_v16 = vshrl.u32 %v3989_v45, 16 }
  0x23   : > { %569 = vmatpush.bf16.msra.mxu0 %v3855_v37  ;;  %v3853_v47 = vld [vmem:[%s5056_s2 + $0x20] sm:$0xff]  ;;  %v717_v52 = vunpack.c.l.b16 %v698_v46  ;;  %v3868_v55 = vld [vmem:[%s5056_s2 + $0x98] sm:$0xff]  ;;  %v3851_v59 = vld [vmem:[%s5056_s2 + $0x10] sm:$0xff]  ;;  %v4315_v0 = vshll.u32 %v4301_v58, 16  ;;  %v4318_v1 = vshrl.u32 %v4301_v58, 16  ;;  %v721_v27 = vrot.slane %v4301_v58, 1 }
  0x24   : > { %670 = vmatpush.bf16.msra.mxu1 %v3058_v32  ;;  %782 = vmatpush.bf16.msra.mxu2 %v3863_v38  ;;  %v3861_v48 = vld [vmem:[%s5056_s2 + $0x60] sm:$0xff]  ;;  %v3859_v60 = vld [vmem:[%s5056_s2 + $0x50] sm:$0xff]  ;;  %v3888_v4 = vld [vmem:[%s5056_s2 + $0x138] sm:$0xff]  ;;  %v485_v17 = vrot.slane %v483_v62, 1  ;;  %vm1359_vm3 = vsmask.f32 4352 }
  0x25   : > { %922 = vmatpush.bf16.msra.mxu3 %v3871_v39  ;;  %v3869_v49 = vld [vmem:[%s5056_s2 + $0xa0] sm:$0xff]  ;;  %v718_v57 = vpack.c.b16 %v4287_v51, %v717_v52  ;;  %v3867_v63 = vld [vmem:[%s5056_s2 + $0x90] sm:$0xff]  ;;  %v3850_v5 = vld [vmem:[%s5056_s2 + $0x8] sm:$0xff]  ;;  %v848_v21 = vrot.slane %v4318_v1, 1  ;;  %v849_v22 = vrot.slane %v4315_v0, 2  ;;  %v490_v25 = vrot.slane %v4315_v0, 1 }
  0x26   : > { %v3858_v6 = vld [vmem:[%s5056_s2 + $0x48] sm:$0xff]  ;;  %v3887_v23 = vld [vmem:[%s5056_s2 + $0x130] sm:$0xff]  ;;  %v3849_v7 = vld [vmem:[%s5056_s2] sm:$0xff]  ;;  %v486_v24 = vor.u32 %v485_v17, %v481_v16  ;;  %vm1099_vm4 = vsmask.f32 5376  ;;  %vm1239_vm6 = vcmask 1044480  }
  0x27   : > { %570 = vmatpush.bf16.msra.mxu0 %v3854_v41  ;;  %v841_v2 = vshrl.u32 %v718_v57, 16  ;;  %v844_v3 = vshll.u32 %v718_v57, 16  ;;  %v3866_v18 = vld [vmem:[%s5056_s2 + $0x88] sm:$0xff]  ;;  %v3857_v8 = vld [vmem:[%s5056_s2 + $0x40] sm:$0xff]  ;;  %v720_v26 = vrot.slane %v718_v57, 1  ;;  %v850_v30 = vor.u32 %v849_v22, %v848_v21  ;;  %v3896_v31 = vld [vmem:[%s5056_s2 + $0x178] sm:$0xff] }
  0x28   : > { %671 = vmatpush.bf16.msra.mxu1 %v3054_v33  ;;  %783 = vmatpush.bf16.msra.mxu2 %v3862_v42  ;;  %v3865_v28 = vld [vmem:[%s5056_s2 + $0x80] sm:$0xff]  ;;  %v3880_v32 = vld [vmem:[%s5056_s2 + $0xf8] sm:$0xff]  ;;  %v491_v34 = vsel %vm479_vm0, %v486_v24, %v490_v25  ;;  %v3886_v36 = vld [vmem:[%s5056_s2 + $0x128] sm:$0xff] }
  0x29   : > { %923 = vmatpush.bf16.msra.mxu3 %v3870_v43  ;;  %v843_v19 = vrot.slane %v841_v2, 1  ;;  %v846_v20 = vrot.slane %v844_v3, 2  ;;  %v3904_v33 = vld [vmem:[%s5056_s2 + $0x1b8] sm:$0xff]  ;;  %v722_v35 = vsel %vm719_vm1, %v720_v26, %v721_v27  ;;  %v3895_v38 = vld [vmem:[%s5056_s2 + $0x170] sm:$0xff]  ;;  %v3885_v42 = vld [vmem:[%s5056_s2 + $0x120] sm:$0xff] }
  0x2a   : > { %v3879_v39 = vld [vmem:[%s5056_s2 + $0xf0] sm:$0xff]  ;;  %v3894_v45 = vld [vmem:[%s5056_s2 + $0x168] sm:$0xff]  ;;  %v3900_v62 = vld [vmem:[%s5056_s2 + $0x198] sm:$0xff] }
  0x2b   : > { %571 = vmatpush.bf16.msra.mxu0 %v3853_v47  ;;  %v847_v29 = vor.u32 %v846_v20, %v843_v19  ;;  %v4376_v41 = vld [vmem:[#allocation2 + $0x10] sm:$0xff]   ;;  %v3878_v46 = vld [vmem:[%s5056_s2 + $0xe8] sm:$0xff]  ;;  %v3881_v22 = vld [vmem:[%s5056_s2 + $0x100] sm:$0xff] }
  0x2c   : > { %672 = vmatpush.bf16.msra.mxu1 %v3050_v40  ;;  %784 = vmatpush.bf16.msra.mxu2 %v3861_v48  ;;  %v3903_v40 = vld [vmem:[%s5056_s2 + $0x1b0] sm:$0xff]  ;;  %v4382_v43 = vshll.u32 %v4376_v41, 16  ;;  %v3902_v47 = vld [vmem:[%s5056_s2 + $0x1a8] sm:$0xff]  ;;  %v3884_v48 = vld [vmem:[%s5056_s2 + $0x118] sm:$0xff] }
  0x2d   : > { %924 = vmatpush.bf16.msra.mxu3 %v3869_v49  ;;  %v851_v37 = vsel %vm839_vm2, %v847_v29, %v850_v30  ;;  %v3022_v49 = vor.u32 %v4185_v10, %v4183_v9  ;;  %v494_v9 = vor.u32 %v4318_v1, %v490_v25  ;;  %v3882_v19 = vld [vmem:[%s5056_s2 + $0x108] sm:$0xff]  ;;  %v3889_v24 = vld [vmem:[%s5056_s2 + $0x140] sm:$0xff] }
  0x2e   : > { %v853_v52 = vrot.slane %v4382_v43, 2  ;;  %v498_v10 = vrot.slane %v4382_v43, 1  ;;  %v3874_v20 = vld [vmem:[%s5056_s2 + $0xc8] sm:$0xff]  ;;  %v818_v25 = vld [vmem:[#allocation2 + $0x20] sm:$0x3] }
  0x2f   : > { %572 = vmatpush.bf16.msra.mxu0 %v3852_v53  ;;  %v3893_v53 = vld [vmem:[%s5056_s2 + $0x160] sm:$0xff]  ;;  %v3898_v21 = vld [vmem:[%s5056_s2 + $0x188] sm:$0xff] }
  0x30   : > { %673 = vmatpush.bf16.msra.mxu1 %v3046_v44  ;;  %785 = vmatpush.bf16.msra.mxu2 %v3860_v54  ;;  %v4385_v44 = vshrl.u32 %v4376_v41, 16  ;;  %v3877_v54 = vld [vmem:[%s5056_s2 + $0xe0] sm:$0xff] }
  0x31   : > { %925 = vmatpush.bf16.msra.mxu3 %v3868_v55  ;;  %v3901_v55 = vld [vmem:[%s5056_s2 + $0x1a0] sm:$0xff] }
  0x32   : > { %v3873_v26 = vld [vmem:[%s5056_s2 + $0xc0] sm:$0xff] }
  0x33   : > { %573 = vmatpush.bf16.msra.mxu0 %v3851_v59  ;;  %v3892_v59 = vld [vmem:[%s5056_s2 + $0x158] sm:$0xff] }
  0x34   : > { %674 = vmatpush.bf16.msra.mxu1 %v3042_v50  ;;  %786 = vmatpush.bf16.msra.mxu2 %v3859_v60  ;;  %v852_v50 = vrot.slane %v4385_v44, 1  ;;  %v3883_v60 = vld [vmem:[%s5056_s2 + $0x110] sm:$0xff] }
  0x35   : > { %926 = vmatpush.bf16.msra.mxu3 %v3867_v63  ;;  %v499_v63 = vsel %vm479_vm0, %v494_v9, %v498_v10 }
  0x36   : > { %v854_v57 = vor.u32 %v853_v52, %v852_v50  ;;  %v3923_v50 = vld [vmem:[%s5056_s2 + $0x238] sm:$0xff] }
  0x37   : > { %574 = vmatpush.bf16.msra.mxu0 %v3850_v5  ;;  %v4435_v5 = vld [vmem:[#allocation2 + $0x18] sm:$0xff]  }
  0x38   : > { %675 = vmatpush.bf16.msra.mxu1 %v3038_v56  ;;  %787 = vmatpush.bf16.msra.mxu2 %v3858_v6  ;;  %v723_v56 = vrot.slane %v4376_v41, 1  ;;  %v855_v3 = vsel %vm839_vm2, %v850_v30, %v854_v57  ;;  %v3875_v6 = vld [vmem:[%s5056_s2 + $0xd0] sm:$0xff]  ;;  %v4444_v16 = vshll.u32 %v4435_v5, 16  ;;  %v4447_v17 = vshrl.u32 %v4435_v5, 16  ;;  %v439_v30 = vld [vmem:[#allocation2 + $0x20] sm:$0x1] }
  0x39   : > { %927 = vmatpush.bf16.msra.mxu3 %v3866_v18  ;;  %v3890_v18 = vld [vmem:[%s5056_s2 + $0x148] sm:$0xff] }
  0x3a   : > { %v724_v2 = vsel %vm719_vm1, %v721_v27, %v723_v56  ;;  %v506_v27 = vrot.slane %v4444_v16, 1 }
  0x3b   : > { %575 = vmatpush.bf16.msra.mxu0 %v3849_v7  ;;  %v856_v7 = vrot.slane %v4447_v17, 1 }
  0x3c   : > { %676 = vmatpush.bf16.msra.mxu1 %v3034_v61  ;;  %788 = vmatpush.bf16.msra.mxu2 %v3857_v8  ;;  %v3876_v61 = vld [vmem:[%s5056_s2 + $0xd8] sm:$0xff]  ;;  %v857_v8 = vrot.slane %v4444_v16, 2 }
  0x3d   : > { %928 = vmatpush.bf16.msra.mxu3 %v3865_v28  ;;  %v725_v28 = vrot.slane %v4435_v5, 1 }
  0x3e   : > { %576 = vmatmul.bf16.vlgmr.msra.gmra.mxu0 %v491_v34  ;;  %v858_v29 = vor.u32 %v857_v8, %v856_v7 }
  0x3f   : > { %677 = vmatmul.bf16.vlgmr.msra.gmra.mxu1 %v3018_v15  ;;  %1041 = vmatpush.bf16.msrb.mxu0 %v3880_v32  ;;  %v3899_v15 = vld [vmem:[%s5056_s2 + $0x190] sm:$0xff]  ;;  %v1368_v32 = vrot.slane %v4318_v1, 3 }
  0x40   : > { %1181 = vmatpush.bf16.msrb.mxu1 %v3888_v4  ;;  %1301 = vmatpush.bf16.msrb.mxu2 %v3896_v31  ;;  %v3891_v4 = vld [vmem:[%s5056_s2 + $0x150] sm:$0xff]  ;;  %v837_v31 = vunpack.c.l.b16 %v818_v25 }
  0x41   : > { %1441 = vmatpush.bf16.msrb.mxu3 %v3904_v33  ;;  %789 = vmatmul.bf16.vlgmr.msra.gmra.mxu2 %v722_v35  ;;  %v1369_v33 = vrot.slane %v4315_v0, 4  ;;  %v726_v35 = vsel %vm719_vm1, %v723_v56, %v725_v28 }
  0x42   : > { %929 = vmatmul.bf16.vlgmr.msra.gmra.mxu3 %v851_v37  ;;  %v859_v37 = vsel %vm839_vm2, %v854_v57, %v858_v29 }
  0x43   : > { %1042 = vmatpush.bf16.msrb.mxu0 %v3879_v39  ;;  %v4487_v39 = vor.u32 %v1369_v33, %v1368_v32  ;;  %v3936_v32 = vld [vmem:[%s5056_s2 + $0x2a0] sm:$0xff] }
  0x44   : > { %1182 = vmatpush.bf16.msrb.mxu1 %v3887_v23  ;;  %1302 = vmatpush.bf16.msrb.mxu2 %v3895_v38  ;;  %v3026_v23 = vor.u32 %v4189_v12, %v4187_v11  ;;  %v3897_v11 = vld [vmem:[%s5056_s2 + $0x180] sm:$0xff]  ;;  %v502_v12 = vor.u32 %v4385_v44, %v498_v10  ;;  %v4485_v38 = vpack.c.b16 %v837_v31, %v837_v31 }
  0x45   : > { %1442 = vmatpush.bf16.msrb.mxu3 %v3903_v40  ;;  %v958_v40 = vld [vmem:[#allocation2] sm:$0xc]  ;;  %v3030_v10 = vor.u32 %v4193_v14, %v4191_v13  ;;  %v3922_v13 = vld [vmem:[%s5056_s2 + $0x230] sm:$0xff] }
  0x46   : > { %v507_v34 = vsel %vm479_vm0, %v502_v12, %v506_v27  ;;  %v977_v52 = vunpack.c.l.b16 %v958_v40  ;;  %v3909_v31 = vld [vmem:[%s5056_s2 + $0x1e0] sm:$0xff] }
  0x47   : > { %1043 = vmatpush.bf16.msrb.mxu0 %v3878_v46  ;;  %v3912_v46 = vld [vmem:[%s5056_s2 + $0x1f8] sm:$0xff] }
  0x48   : > { %1183 = vmatpush.bf16.msrb.mxu1 %v3886_v36  ;;  %1303 = vmatpush.bf16.msrb.mxu2 %v3894_v45  ;;  %v473_v36 = vunpack.c.l.b16 %v439_v30  ;;  %v3931_v45 = vld [vmem:[%s5056_s2 + $0x278] sm:$0xff]  ;;  %v3928_v30 = vld [vmem:[%s5056_s2 + $0x260] sm:$0xff] }
  0x49   : > { %1443 = vmatpush.bf16.msrb.mxu3 %v3902_v47  ;;  %v3939_v47 = vld [vmem:[%s5056_s2 + $0x2b8] sm:$0xff] }
  0x4b   : > { %1044 = vmatpush.bf16.msrb.mxu0 %v3877_v54  ;;  %v3911_v54 = vld [vmem:[%s5056_s2 + $0x1f0] sm:$0xff] }
  0x4c   : > { %1184 = vmatpush.bf16.msrb.mxu1 %v3885_v42  ;;  %1304 = vmatpush.bf16.msrb.mxu2 %v3893_v53  ;;  %v478_v42 = vpack.c.b16 %v473_v36, %v473_v36  ;;  %v3930_v53 = vld [vmem:[%s5056_s2 + $0x270] sm:$0xff] }
  0x4d   : > { %1444 = vmatpush.bf16.msrb.mxu3 %v3901_v55  ;;  %v3938_v55 = vld [vmem:[%s5056_s2 + $0x2b0] sm:$0xff] }
  0x4e   : > { %581 = vmatmul.bf16.gmra.mxu0 %v499_v63  ;;  %v512_v9 = vshll.u32 %v478_v42, 16  ;;  %v727_v63 = vrot.slane %v478_v42, 1  ;;  %v1241_v42 = vrot.slane %v4301_v58, 3 }
  0x4f   : > { %682 = vmatmul.bf16.gmra.mxu1 %v3022_v49  ;;  %1045 = vmatpush.bf16.msrb.mxu0 %v3876_v61  ;;  %v864_v49 = vshll.u32 %v4485_v38, 16  ;;  %v510_v61 = vor.u32 %v4447_v17, %v506_v27  ;;  %v3921_v27 = vld [vmem:[%s5056_s2 + $0x228] sm:$0xff] }
  0x50   : > { %1185 = vmatpush.bf16.msrb.mxu1 %v3884_v48  ;;  %1305 = vmatpush.bf16.msrb.mxu2 %v3892_v59  ;;  %v861_v48 = vshrl.u32 %v4485_v38, 16  ;;  %v4515_v59 = vpack.c.b16 %v4287_v51, %v977_v52 }
  0x51   : > { %1445 = vmatpush.bf16.msrb.mxu3 %v3900_v62  ;;  %794 = vmatmul.bf16.gmra.mxu2 %v724_v2  ;;  %v866_v57 = vrot.slane %v864_v49, 2  ;;  %v514_v62 = vrot.slane %v512_v9, 1 }
  0x52   : > { %934 = vmatmul.bf16.gmra.mxu3 %v855_v3  ;;  %v863_v56 = vrot.slane %v861_v48, 1  ;;  %v1101_v14 = vshrl.u32 %v4515_v59, 16  ;;  %v980_v36 = vrot.slane %v4515_v59, 2  ;;  %v1377_v48 = vrot.slane %v4444_v16, 4 }
  0x53   : > { %1046 = vmatpush.bf16.msrb.mxu0 %v3875_v6  ;;  %v1372_v6 = vrot.slane %v4385_v44, 3 }
  0x54   : > { %1186 = vmatpush.bf16.msrb.mxu1 %v3883_v60  ;;  %1306 = vmatpush.bf16.msrb.mxu2 %v3891_v4  ;;  %v1218_v60 = vld [vmem:[#allocation2] sm:$0x8]  ;;  %v867_v2 = vor.u32 %v866_v57, %v863_v56  ;;  %v1104_v4 = vshll.u32 %v4515_v59, 16  ;;  %v1103_v7 = vrot.slane %v1101_v14, 2  ;;  %v3926_v57 = vld [vmem:[%s5056_s2 + $0x250] sm:$0xff]  ;;  %v1116_v14 = vrot.slane %v4447_v17, 2 }
  0x55   : > { %1446 = vmatpush.bf16.msrb.mxu3 %v3899_v15  ;;  %v1237_v3 = vunpack.c.l.b16 %v1218_v60  ;;  %v1373_v15 = vrot.slane %v4382_v43, 4  ;;  %v3907_v59 = vld [vmem:[%s5056_s2 + $0x1d0] sm:$0xff] }
  0x56   : > { %v1106_v8 = vrot.slane %v1104_v4, 3  ;;  %v3934_v60 = vld [vmem:[%s5056_s2 + $0x290] sm:$0xff]  ;;  %v1117_v4 = vrot.slane %v4444_v16, 3  ;;  %v3917_v16 = vld [vmem:[%s5056_s2 + $0x208] sm:$0xff] }
  0x57   : > { %1047 = vmatpush.bf16.msrb.mxu0 %v3874_v20  ;;  %v868_v20 = vsel %vm839_vm2, %v858_v29, %v867_v2  ;;  %v3918_v2 = vld [vmem:[%s5056_s2 + $0x210] sm:$0xff] }
  0x58   : > { %1187 = vmatpush.bf16.msrb.mxu1 %v3882_v19  ;;  %1307 = vmatpush.bf16.msrb.mxu2 %v3890_v18  ;;  %v515_v18 = vsel %vm479_vm0, %v510_v61, %v514_v62  ;;  %v728_v19 = vsel %vm719_vm1, %v725_v28, %v727_v63  ;;  %v1107_v28 = vor.u32 %v1106_v8, %v1103_v7  ;;  %v983_v62 = vrot.slane %v4376_v41, 2  ;;  %v3916_v7 = vld [vmem:[%s5056_s2 + $0x200] sm:$0xff] }
  0x59   : > { %1447 = vmatpush.bf16.msrb.mxu3 %v3898_v21  ;;  %v1108_v21 = vrot.slane %v4318_v1, 2  ;;  %v3910_v1 = vld [vmem:[%s5056_s2 + $0x1e8] sm:$0xff]  ;;  %v1243_v63 = vrot.slane %v4376_v41, 3  ;;  %v3905_v8 = vld [vmem:[%s5056_s2 + $0x1c0] sm:$0xff] }
  0x5a   : > { %v3925_v41 = vld [vmem:[%s5056_s2 + $0x248] sm:$0xff] }
  0x5b   : > { %1048 = vmatpush.bf16.msrb.mxu0 %v3873_v26  ;;  %v3929_v26 = vld [vmem:[%s5056_s2 + $0x268] sm:$0xff] }
  0x5c   : > { %1188 = vmatpush.bf16.msrb.mxu1 %v3881_v22  ;;  %1308 = vmatpush.bf16.msrb.mxu2 %v3889_v24  ;;  %v1238_v22 = vpack.c.b16 %v4287_v51, %v1237_v3  ;;  %v1109_v24 = vrot.slane %v4315_v0, 3  ;;  %v3937_v0 = vld [vmem:[%s5056_s2 + $0x2a8] sm:$0xff] }
  0x5d   : > { %1448 = vmatpush.bf16.msrb.mxu3 %v3897_v11 }
  0x5e   : > { %586 = vmatmul.bf16.gmra.mxu0 %v507_v34  ;;  %v1361_v11 = vshrl.u32 %v1238_v22, 16  ;;  %v1364_v12 = vshll.u32 %v1238_v22, 16  ;;  %v1110_v29 = vor.u32 %v1109_v24, %v1108_v21  ;;  %v1240_v40 = vrot.slane %v1238_v22, 3  ;;  %v1338_v21 = vld [vmem:[#allocation2 + $0x20] sm:$0xf] }
  0x5f   : > { %687 = vmatmul.bf16.gmra.mxu1 %v3026_v23  ;;  %1551 = vmatpush.bf16.msra.mxu0 %v3912_v46  ;;  %v1374_v23 = vor.u32 %v1373_v15, %v1372_v6  ;;  %v3920_v46 = vld [vmem:[%s5056_s2 + $0x220] sm:$0xff]  ;;  %v3906_v15 = vld [vmem:[%s5056_s2 + $0x1c8] sm:$0xff] }
  0x60   : > { %1844 = vmatpush.bf16.msra.mxu2 %v3931_v45  ;;  %1725 = vmatpush.bf16.msra.mxu1 %v3923_v50  ;;  %v1363_v33 = vrot.slane %v1361_v11, 3  ;;  %v1366_v34 = vrot.slane %v1364_v12, 4  ;;  %v1242_v50 = vsel %vm1239_vm6, %v1240_v40, %v1241_v42  ;;  %v1078_v6 = vld [vmem:[#allocation2 + $0x20] sm:$0x7] }
  0x61   : > { %799 = vmatmul.bf16.gmra.mxu2 %v726_v35  ;;  %1983 = vmatpush.bf16.msra.mxu3 %v3939_v47  ;;  %v4533_v25 = vsel %vm1359_vm3, %v4487_v39, %v1374_v23  ;;  %v1111_v35 = vsel %vm1099_vm4, %v1107_v28, %v1110_v29  ;;  %v1376_v47 = vrot.slane %v4447_v17, 3  ;;  %v1118_v17 = vor.u32 %v1117_v4, %v1116_v14  ;;  %v3932_v24 = vld [vmem:[%s5056_s2 + $0x280] sm:$0xff] }
  0x62   : > { %939 = vmatmul.bf16.gmra.mxu3 %v859_v37  ;;  %v981_v37 = vrot.slane %v4301_v58, 2  ;;  %v1367_v45 = vor.u32 %v1366_v34, %v1363_v33  ;;  %v3947_v33 = vld [vmem:[%s5056_s2 + $0x2f8] sm:$0xff] }
  0x63   : > { %1552 = vmatpush.bf16.msra.mxu0 %v3911_v54  ;;  %v1112_v54 = vrot.slane %v4385_v44, 2  ;;  %v3935_v44 = vld [vmem:[%s5056_s2 + $0x298] sm:$0xff] }
  0x64   : > { %1845 = vmatpush.bf16.msra.mxu2 %v3930_v53  ;;  %1726 = vmatpush.bf16.msra.mxu1 %v3922_v13  ;;  %v982_v49 = vsel %vm979_vm5, %v980_v36, %v981_v37  ;;  %v1371_v52 = vsel %vm1359_vm3, %v1367_v45, %v4487_v39  ;;  %v4569_v53 = vor.u32 %v1377_v48, %v1376_v47  ;;  %v3908_v39 = vld [vmem:[%s5056_s2 + $0x1d8] sm:$0xff]  ;;  %v3962_v47 = vld [vmem:[%s5056_s2 + $0x370] sm:$0xff] }
  0x65   : > { %1984 = vmatpush.bf16.msra.mxu3 %v3938_v55  ;;  %v1113_v55 = vrot.slane %v4382_v43, 3  ;;  %v3919_v43 = vld [vmem:[%s5056_s2 + $0x218] sm:$0xff]  ;;  %v984_v3 = vsel %vm979_vm5, %v981_v37, %v983_v62  ;;  %v1244_v13 = vsel %vm1239_vm6, %v1241_v42, %v1243_v63 }
  0x66   : > { %v4575_v9 = vsel %vm1359_vm3, %v1374_v23, %v4569_v53  ;;  %v3971_v34 = vld [vmem:[%s5056_s2 + $0x3b8] sm:$0xff] }
  0x67   : > { %1553 = vmatpush.bf16.msra.mxu0 %v3910_v1  ;;  %v1114_v56 = vor.u32 %v1113_v55, %v1112_v54  ;;  %v4636_v1 = vunpack.c.l.b16 %v1338_v21  ;;  %v987_v54 = vrot.slane %v4485_v38, 2  ;;  %v3954_v38 = vld [vmem:[%s5056_s2 + $0x330] sm:$0xff] }
  0x68   : > { %1846 = vmatpush.bf16.msra.mxu2 %v3929_v26  ;;  %1727 = vmatpush.bf16.msra.mxu1 %v3921_v27  ;;  %v1245_v26 = vrot.slane %v4435_v5, 3 }
  0x69   : > { %1985 = vmatpush.bf16.msra.mxu3 %v3937_v0  ;;  %v1115_v61 = vsel %vm1099_vm4, %v1110_v29, %v1114_v56  ;;  %v1119_v22 = vsel %vm1099_vm4, %v1114_v56, %v1118_v17  ;;  %v1358_v28 = vpack.c.b16 %v4636_v1, %v4636_v1 }
  0x6a   : > { %v1246_v27 = vsel %vm1239_vm6, %v1243_v63, %v1245_v26  ;;  %v3961_v63 = vld [vmem:[%s5056_s2 + $0x368] sm:$0xff] }
  0x6b   : > { %1554 = vmatpush.bf16.msra.mxu0 %v3909_v31  ;;  %v1588_v31 = vld [vmem:[#allocation2 + $0x4] sm:$0xff]   ;;  %v1384_v36 = vshll.u32 %v1358_v28, 16 }
  0x6c   : > { %1847 = vmatpush.bf16.msra.mxu2 %v3928_v30  ;;  %1728 = vmatpush.bf16.msra.mxu1 %v3920_v46  ;;  %v4652_v40 = vunpack.c.h.b16 %v1588_v31  ;;  %v3955_v46 = vld [vmem:[%s5056_s2 + $0x338] sm:$0xff] }
  0x6d   : > { %1986 = vmatpush.bf16.msra.mxu3 %v3936_v32  ;;  %v3963_v32 = vld [vmem:[%s5056_s2 + $0x378] sm:$0xff]  ;;  %v1386_v45 = vrot.slane %v1384_v36, 4 }
  0x6e   : > { %591 = vmatmul.bf16.gmra.mxu0 %v515_v18  ;;  %v3933_v18 = vld [vmem:[%s5056_s2 + $0x288] sm:$0xff] }
  0x6f   : > { %692 = vmatmul.bf16.gmra.mxu1 %v3030_v10  ;;  %v3927_v10 = vld [vmem:[%s5056_s2 + $0x258] sm:$0xff]  ;;  %1555 = vmatpush.bf16.msra.mxu0 %v3908_v39  ;;  %v4668_v39 = vld [vmem:[#allocation2 + $0xc] sm:$0xff] }
  0x70   : > { %1848 = vmatpush.bf16.msra.mxu2 %v3927_v10  ;;  %1729 = vmatpush.bf16.msra.mxu1 %v3919_v43 }
  0x71   : > { %804 = vmatmul.bf16.gmra.mxu2 %v728_v19  ;;  %1987 = vmatpush.bf16.msra.mxu3 %v3935_v44  ;;  %v1097_v19 = vunpack.c.l.b16 %v1078_v6  ;;  %v1640_v44 = vshll.u32 %v1588_v31, 16 }
  0x72   : > { %944 = vmatmul.bf16.gmra.mxu3 %v868_v20  ;;  %v3924_v20 = vld [vmem:[%s5056_s2 + $0x240] sm:$0xff] }
  0x73   : > { %1556 = vmatpush.bf16.msra.mxu0 %v3907_v59  ;;  %v1098_v23 = vpack.c.b16 %v1097_v19, %v1097_v19  ;;  %v3960_v19 = vld [vmem:[%s5056_s2 + $0x360] sm:$0xff] }
  0x74   : > { %1849 = vmatpush.bf16.msra.mxu2 %v3926_v57  ;;  %1730 = vmatpush.bf16.msra.mxu1 %v3918_v2  ;;  %v3969_v2 = vld [vmem:[%s5056_s2 + $0x3a8] sm:$0xff] }
  0x75   : > { %1988 = vmatpush.bf16.msra.mxu3 %v3934_v60  ;;  %v1121_v0 = vshrl.u32 %v1098_v23, 16  ;;  %v1124_v11 = vshll.u32 %v1098_v23, 16  ;;  %v1247_v55 = vrot.slane %v1098_v23, 3  ;;  %v1638_v60 = vshrl.u32 %v1588_v31, 16  ;;  %v3968_v23 = vld [vmem:[%s5056_s2 + $0x3a0] sm:$0xff] }
  0x77   : > { %1557 = vmatpush.bf16.msra.mxu0 %v3906_v15  ;;  %v1123_v29 = vrot.slane %v1121_v0, 2  ;;  %v1126_v30 = vrot.slane %v1124_v11, 3  ;;  %v1248_v56 = vsel %vm1239_vm6, %v1245_v26, %v1247_v55  ;;  %v4711_v0 = vld [vmem:[#allocation2 + $0x14] sm:$0xff] }
  0x78   : > { %1850 = vmatpush.bf16.msra.mxu2 %v3925_v41  ;;  %1731 = vmatpush.bf16.msra.mxu1 %v3917_v16  ;;  %v4720_v31 = vshll.u32 %v4711_v0, 16 }
  0x79   : > { %1989 = vmatpush.bf16.msra.mxu3 %v3933_v18  ;;  %v1127_v37 = vor.u32 %v1126_v30, %v1123_v29  ;;  %v3952_v29 = vld [vmem:[%s5056_s2 + $0x320] sm:$0xff] }
  0x7b   : > { %1558 = vmatpush.bf16.msra.mxu0 %v3905_v8  ;;  %v1128_v48 = vsel %vm1099_vm4, %v1118_v17, %v1127_v37  ;;  %v3953_v17 = vld [vmem:[%s5056_s2 + $0x328] sm:$0xff]  ;;  %v1655_v37 = vrot.slane %v4720_v31, 1 }
  0x7c   : > { %1851 = vmatpush.bf16.msra.mxu2 %v3924_v20  ;;  %1732 = vmatpush.bf16.msra.mxu1 %v3916_v7  ;;  %v3994_v7 = vunpack.c.l.b16 %v4301_v58 }
  0x7d   : > { %1990 = vmatpush.bf16.msra.mxu3 %v3932_v24  ;;  %v1784_v24 = vrot.slane %v4668_v39, 1 }
  0x7e   : > { %1049 = vmatmul.bf16.vlgmr.msrb.gmra.mxu0 %v982_v49  ;;  %v1762_v49 = vld [vmem:[#allocation2 + $0x4] sm:$0xe]  ;;  %v1495_v11 = vpack.c.b16 %v3994_v7, %v4287_v51  ;;  %v3959_v51 = vld [vmem:[%s5056_s2 + $0x358] sm:$0xff]  ;;  %v1596_v7 = vld [vmem:[#allocation2 + $0x24] sm:$0x1] }
  0x7f   : > { %1189 = vmatmul.bf16.vlgmr.msrb.gmra.mxu1 %v1111_v35  ;;  %v1381_v35 = vshrl.u32 %v1358_v28, 16  ;;  %2102 = vmatpush.bf16.msrb.mxu0 %v3947_v33  ;;  %v1781_v10 = vunpack.c.l.b16 %v1762_v49  ;;  %v3967_v33 = vld [vmem:[%s5056_s2 + $0x398] sm:$0xff] }
  0x80   : > { %2241 = vmatpush.bf16.msrb.mxu1 %v3955_v46 }
  0x81   : > { %1309 = vmatmul.bf16.vlgmr.msrb.gmra.mxu2 %v1242_v50  ;;  %v1383_v42 = vrot.slane %v1381_v35, 3  ;;  %v3946_v50 = vld [vmem:[%s5056_s2 + $0x2f0] sm:$0xff]  ;;  %v1782_v59 = vpack.c.b16 %v4652_v40, %v1781_v10 }
  0x82   : > { %1449 = vmatmul.bf16.vlgmr.msrb.gmra.mxu3 %v1371_v52  ;;  %2360 = vmatpush.bf16.msrb.mxu2 %v3963_v32  ;;  %v3970_v52 = vld [vmem:[%s5056_s2 + $0x3b0] sm:$0xff]  ;;  %v3943_v32 = vld [vmem:[%s5056_s2 + $0x2d8] sm:$0xff] }
  0x83   : > { %2499 = vmatpush.bf16.msrb.mxu3 %v3971_v34  ;;  %2103 = vmatpush.bf16.msrb.mxu0 %v3946_v50  ;;  %v1906_v14 = vshll.u32 %v1782_v59, 16  ;;  %v1783_v8 = vrot.slane %v1782_v59, 1  ;;  %v4732_v34 = vshrl.u32 %v4711_v0, 16  ;;  %v1915_v50 = vrot.slane %v4720_v31, 2  ;;  %v3942_v10 = vld [vmem:[%s5056_s2 + $0x2d0] sm:$0xff] }
  0x84   : > { %2242 = vmatpush.bf16.msrb.mxu1 %v3954_v38 }
  0x85   : > { %v1908_v15 = vrot.slane %v1906_v14, 2  ;;  %v1914_v49 = vrot.slane %v4732_v34, 1 }
  0x86   : > { %2361 = vmatpush.bf16.msrb.mxu2 %v3962_v47 }
  0x87   : > { %2500 = vmatpush.bf16.msrb.mxu3 %v3970_v52  ;;  %v3951_v52 = vld [vmem:[%s5056_s2 + $0x318] sm:$0xff] }
  0x88   : > { %2243 = vmatpush.bf16.msrb.mxu1 %v3953_v17 }
  0x8a   : > { %2362 = vmatpush.bf16.msrb.mxu2 %v3961_v63 }
  0x8b   : > { %2501 = vmatpush.bf16.msrb.mxu3 %v3969_v2 }
  0x8c   : > { %2244 = vmatpush.bf16.msrb.mxu1 %v3952_v29 }
  0x8e   : > { %1054 = vmatmul.bf16.gmra.mxu0 %v984_v3  ;;  %v4691_v3 = vshrl.u32 %v4668_v39, 16  ;;  %2363 = vmatpush.bf16.msrb.mxu2 %v3960_v19 }
  0x8f   : > { %1194 = vmatmul.bf16.gmra.mxu1 %v1115_v61  ;;  %v1642_v61 = vrot.slane %v1640_v44, 1  ;;  %2502 = vmatpush.bf16.msrb.mxu3 %v3968_v23  ;;  %v3966_v44 = vld [vmem:[%s5056_s2 + $0x390] sm:$0xff] }
  0x90   : > { %v1910_v18 = vrot.slane %v4691_v3, 1  ;;  %2245 = vmatpush.bf16.msrb.mxu1 %v3951_v52 }
  0x91   : > { %1314 = vmatmul.bf16.gmra.mxu2 %v1244_v13  ;;  %v1903_v13 = vshrl.u32 %v1782_v59, 16  ;;  %v1643_v4 = vor.u32 %v1642_v61, %v1638_v60  ;;  %v4756_v59 = vld [vmem:[#allocation2 + $0x1c] sm:$0xff]  ;;  %v4042_v61 = vld [vmem:[#allocation2 + $0xc] sm:$0xff]  }
  0x92   : > { %1454 = vmatmul.bf16.gmra.mxu3 %v4533_v25  ;;  %v985_v25 = vrot.slane %v4435_v5, 2  ;;  %2364 = vmatpush.bf16.msrb.mxu2 %v3959_v51  ;;  %v4781_v17 = vshrl.u32 %v4756_v59, 16  ;;  %v3948_v51 = vld [vmem:[%s5056_s2 + $0x300] sm:$0xff] }
  0x93   : > { %v1905_v41 = vrot.slane %v1903_v13, 1  ;;  %2503 = vmatpush.bf16.msrb.mxu3 %v3967_v33  ;;  %v3964_v33 = vld [vmem:[%s5056_s2 + $0x380] sm:$0xff] }
  0x94   : > { %v986_v12 = vsel %vm979_vm5, %v983_v62, %v985_v25  ;;  %v988_v43 = vsel %vm979_vm5, %v985_v25, %v987_v54  ;;  %v4679_v62 = vshll.u32 %v4668_v39, 16  ;;  %v3958_v54 = vld [vmem:[%s5056_s2 + $0x350] sm:$0xff] }
  0x95   : > { %v1909_v25 = vor.u32 %v1908_v15, %v1905_v41  ;;  %v4769_v41 = vshll.u32 %v4756_v59, 16  ;;  %v3957_v15 = vld [vmem:[%s5056_s2 + $0x348] sm:$0xff] }
  0x96   : > { %v1647_v6 = vrot.slane %v4679_v62, 1  ;;  %v1911_v16 = vrot.slane %v4679_v62, 2  ;;  %2365 = vmatpush.bf16.msrb.mxu2 %v3958_v54 }
  0x97   : > { %2504 = vmatpush.bf16.msrb.mxu3 %v3966_v44 }
  0x98   : > { %v1648_v21 = vsel %vm479_vm0, %v1643_v4, %v1647_v6  ;;  %v1912_v26 = vor.u32 %v1911_v16, %v1910_v18  ;;  %v1651_v36 = vor.u32 %v4691_v3, %v1647_v6  ;;  %v3950_v4 = vld [vmem:[%s5056_s2 + $0x310] sm:$0xff]  ;;  %v3941_v18 = vld [vmem:[%s5056_s2 + $0x2c8] sm:$0xff] }
  0x99   : > { %2246 = vmatpush.bf16.msrb.mxu1 %v3950_v4  ;;  %v3965_v16 = vld [vmem:[%s5056_s2 + $0x388] sm:$0xff] }
  0x9a   : > { %v1913_v58 = vsel %vm839_vm2, %v1909_v25, %v1912_v26  ;;  %2366 = vmatpush.bf16.msrb.mxu2 %v3957_v15 }
  0x9b   : > { %2505 = vmatpush.bf16.msrb.mxu3 %v3965_v16 }
  0x9e   : > { %1059 = vmatmul.bf16.gmra.mxu0 %v986_v12 }
  0x9f   : > { %1199 = vmatmul.bf16.gmra.mxu1 %v1119_v22  ;;  %v3944_v22 = vld [vmem:[%s5056_s2 + $0x2e0] sm:$0xff]  ;;  %2506 = vmatpush.bf16.msrb.mxu3 %v3964_v33 }
  0xa1   : > { %1319 = vmatmul.bf16.gmra.mxu2 %v1246_v27  ;;  %v1785_v27 = vsel %vm719_vm1, %v1783_v8, %v1784_v24  ;;  %v3949_v8 = vld [vmem:[%s5056_s2 + $0x308] sm:$0xff] }
  0xa2   : > { %1459 = vmatmul.bf16.gmra.mxu3 %v4575_v9  ;;  %v1387_v9 = vor.u32 %v1386_v45, %v1383_v42  ;;  %2247 = vmatpush.bf16.msrb.mxu1 %v3949_v8 }
  0xa4   : > { %v1388_v57 = vsel %vm1359_vm3, %v4569_v53, %v1387_v9  ;;  %v3945_v53 = vld [vmem:[%s5056_s2 + $0x2e8] sm:$0xff]  ;;  %v1656_v9 = vsel %vm479_vm0, %v1651_v36, %v1655_v37 }
  0xa5   : > { %2104 = vmatpush.bf16.msrb.mxu0 %v3945_v53 }
  0xa6   : > { %2248 = vmatpush.bf16.msrb.mxu1 %v3948_v51  ;;  %v2430_v51 = vrot.slane %v4732_v34, 3 }
  0xa9   : > { %2105 = vmatpush.bf16.msrb.mxu0 %v3944_v22 }
  0xad   : > { %2106 = vmatpush.bf16.msrb.mxu0 %v3943_v32  ;;  %v3940_v32 = vld [vmem:[%s5056_s2 + $0x2c0] sm:$0xff] }
  0xae   : > { %1064 = vmatmul.bf16.gmra.mxu0 %v988_v43  ;;  %v1786_v43 = vrot.slane %v4711_v0, 1 }
  0xaf   : > { %1204 = vmatmul.bf16.gmra.mxu1 %v1128_v48 }
  0xb0   : > { %v1787_v53 = vsel %vm719_vm1, %v1784_v24, %v1786_v43 }
  0xb1   : > { %1324 = vmatmul.bf16.gmra.mxu2 %v1248_v56  ;;  %2107 = vmatpush.bf16.msrb.mxu0 %v3942_v10  ;;  %v4754_v56 = vor.u32 %v1915_v50, %v1914_v49  ;;  %v4043_v49 = vld [vmem:[#allocation2 + $0x14] sm:$0xff]  }
  0xb2   : > { %1464 = vmatmul.bf16.gmra.mxu3 %v1388_v57 }
  0xb3   : > { %v1917_v14 = vsel %vm839_vm2, %v1912_v26, %v4754_v56 }
  0xb5   : > { %2108 = vmatpush.bf16.msrb.mxu0 %v3941_v18 }
  0xb9   : > { %2109 = vmatpush.bf16.msrb.mxu0 %v3940_v32  ;;  %v2431_v32 = vrot.slane %v4720_v31, 4 }
  0xbb   : > { %v577_v12 = vpop.f32.mrf.mxu0 }
  0xbc   : > { %v678_v20 = vpop.f32.mrf.mxu1 }
  0xbd   : > { %v679_v28 = vadd.f32 %v678_v20, %v577_v12  ;;  %v1659_v20 = vor.u32 %v4732_v34, %v1655_v37  ;;  %v1919_v12 = vrot.slane %v4769_v41, 2 }
  0xbe   : > { %1559 = vmatmul.bf16.vlgmr.msra.gmra.mxu0 %v1495_v11  ;;  %v1918_v11 = vrot.slane %v4781_v17, 1 }
  0xbf   : > { %1733 = vmatmul.bf16.vlgmr.msra.gmra.mxu1 %v1648_v21  ;;  %v1663_v21 = vrot.slane %v4769_v41, 1 }
  0xc0   : > { %v1920_v37 = vor.u32 %v1919_v12, %v1918_v11 }
  0xc1   : > { %1852 = vmatmul.bf16.vlgmr.msra.gmra.mxu2 %v1785_v27  ;;  %v1881_v27 = vld [vmem:[#allocation2 + $0x24] sm:$0x3]  ;;  %v1664_v29 = vsel %vm479_vm0, %v1659_v20, %v1663_v21 }
  0xc2   : > { %1991 = vmatmul.bf16.vlgmr.msra.gmra.mxu3 %v1913_v58  ;;  %v1900_v36 = vunpack.c.l.b16 %v1881_v27  ;;  %v1921_v10 = vsel %vm839_vm2, %v4754_v56, %v1920_v37  ;;  %v2426_v27 = vrot.slane %v4691_v3, 3 }
  0xc3   : > { %v579_v46 = vpop.f32.mrf.mxu0 }
  0xc4   : > { %v680_v30 = vpop.f32.mrf.mxu1  ;;  %v790_v35 = vpop.f32.mrf.mxu2  ;;  %v4809_v54 = vpack.c.b16 %v1900_v36, %v1900_v36 }
  0xc5   : > { %v810_v42 = vadd.f32 %v790_v35, %v679_v28  ;;  %v930_v45 = vpop.f32.mrf.mxu3  ;;  %v681_v48 = vadd.f32 %v680_v30, %v579_v46  ;;  %v3956_v28 = vld [vmem:[%s5056_s2 + $0x340] sm:$0xff]  ;;  %v1631_v30 = vunpack.c.l.b16 %v1596_v7  ;;  %v1788_v35 = vrot.slane %v4756_v59, 1 }
  0xc6   : > { %2367 = vmatpush.bf16.msrb.mxu2 %v3956_v28  ;;  %v4003_v7 = vunpack.c.h.b16 %v4435_v5  ;;  %v2427_v28 = vrot.slane %v4679_v62, 4 }
  0xc7   : > { %v4736_v47 = vadd.f32 %v930_v45, %v810_v42  ;;  %v1636_v45 = vpack.c.b16 %v1631_v30, %v1631_v30  ;;  %v1789_v52 = vsel %vm719_vm1, %v1786_v43, %v1788_v35  ;;  %v1667_v43 = vor.u32 %v4781_v17, %v1663_v21 }
  0xc8   : > { %v1498_v30 = vpack.c.b16 %v4636_v1, %v4003_v7  ;;  %v2434_v7 = vrot.slane %v4781_v17, 3 }
  0xc9   : > { %v1790_v8 = vrot.slane %v1636_v45, 1 }
  0xcb   : > { %v582_v63 = vpop.f32.mrf.mxu0  ;;  %v1791_v33 = vsel %vm719_vm1, %v1788_v35, %v1790_v8  ;;  %v2435_v8 = vrot.slane %v4769_v41, 4 }
  0xcc   : > { %v683_v55 = vpop.f32.mrf.mxu1  ;;  %v792_v57 = vpop.f32.mrf.mxu2 }
  0xcd   : > { %v811_v38 = vadd.f32 %v792_v57, %v681_v48  ;;  %v932_v60 = vpop.f32.mrf.mxu3  ;;  %v684_v13 = vadd.f32 %v683_v55, %v582_v63  ;;  %v1669_v57 = vshll.u32 %v1636_v45, 16 }
  0xce   : > { %1564 = vmatmul.bf16.gmra.mxu0 %v4042_v61  ;;  %v1926_v61 = vshll.u32 %v4809_v54, 16 }
  0xcf   : > { %1738 = vmatmul.bf16.gmra.mxu1 %v1656_v9  ;;  %v4761_v2 = vadd.f32 %v932_v60, %v811_v38  ;;  %v2020_v38 = vld [vmem:[#allocation2 + $0x4] sm:$0xc]  ;;  %v1923_v60 = vshrl.u32 %v4809_v54, 16 }
  0xd0   : > { %v1928_v56 = vrot.slane %v1926_v61, 2 }
  0xd1   : > { %1857 = vmatmul.bf16.gmra.mxu2 %v1787_v53  ;;  %v1671_v53 = vrot.slane %v1669_v57, 1  ;;  %v1925_v15 = vrot.slane %v1923_v60, 1 }
  0xd2   : > { %1996 = vmatmul.bf16.gmra.mxu3 %v1917_v14 }
  0xd3   : > { %v584_v24 = vpop.f32.mrf.mxu0  ;;  %v1672_v20 = vsel %vm479_vm0, %v1667_v43, %v1671_v53  ;;  %v1929_v21 = vor.u32 %v1928_v56, %v1925_v15  ;;  %v2300_v56 = vrot.slane %v4668_v39, 3 }
  0xd4   : > { %v685_v6 = vpop.f32.mrf.mxu1  ;;  %v795_v19 = vpop.f32.mrf.mxu2 }
  0xd5   : > { %v812_v22 = vadd.f32 %v795_v19, %v684_v13  ;;  %v935_v23 = vpop.f32.mrf.mxu3  ;;  %v686_v26 = vadd.f32 %v685_v6, %v584_v24  ;;  %v2039_v13 = vunpack.c.l.b16 %v2020_v38  ;;  %v1930_v36 = vsel %vm839_vm2, %v1920_v37, %v1929_v21 }
  0xd7   : > { %v4788_v25 = vadd.f32 %v935_v23, %v812_v22  ;;  %v2040_v22 = vpack.c.b16 %v4652_v40, %v2039_v13  ;;  %v2278_v23 = vld [vmem:[#allocation2 + $0x4] sm:$0x8] }
  0xd8   : > { %v2297_v24 = vunpack.c.l.b16 %v2278_v23 }
  0xd9   : > { %v2161_v11 = vshrl.u32 %v2040_v22, 16  ;;  %v2164_v12 = vshll.u32 %v2040_v22, 16 }
  0xdb   : > { %v587_v50 = vpop.f32.mrf.mxu0  ;;  %v2163_v1 = vrot.slane %v2161_v11, 2 }
  0xdc   : > { %v688_v58 = vpop.f32.mrf.mxu1  ;;  %v797_v42 = vpop.f32.mrf.mxu2 }
  0xdd   : > { %v813_v46 = vadd.f32 %v797_v42, %v686_v26  ;;  %v937_v48 = vpop.f32.mrf.mxu3  ;;  %v689_v9 = vadd.f32 %v688_v58, %v587_v50  ;;  %v2168_v42 = vrot.slane %v4691_v3, 2 }
  0xde   : > { %1569 = vmatmul.bf16.gmra.mxu0 %v4043_v49  ;;  %v2298_v49 = vpack.c.b16 %v4652_v40, %v2297_v24 }
  0xdf   : > { %1743 = vmatmul.bf16.gmra.mxu1 %v1664_v29  ;;  %v4811_v55 = vadd.f32 %v937_v48, %v813_v46  ;;  %v2169_v48 = vrot.slane %v4679_v62, 3 }
  0xe0   : > { %v2419_v37 = vshrl.u32 %v2298_v49, 16  ;;  %v2422_v3 = vshll.u32 %v2298_v49, 16  ;;  %v2299_v15 = vrot.slane %v2298_v49, 3 }
  0xe1   : > { %1862 = vmatmul.bf16.gmra.mxu2 %v1789_v52  ;;  %v2166_v52 = vrot.slane %v2164_v12, 3  ;;  %v2170_v38 = vor.u32 %v2169_v48, %v2168_v42  ;;  %v2044_v42 = vrot.slane %v4711_v0, 2 }
  0xe2   : > { %2001 = vmatmul.bf16.gmra.mxu3 %v1921_v10  ;;  %v2432_v10 = vor.u32 %v2431_v32, %v2430_v51  ;;  %v2421_v43 = vrot.slane %v2419_v37, 3  ;;  %v2424_v53 = vrot.slane %v2422_v3, 4  ;;  %v2176_v37 = vrot.slane %v4781_v17, 2 }
  0xe3   : > { %v589_v6 = vpop.f32.mrf.mxu0  ;;  %v2167_v57 = vor.u32 %v2166_v52, %v2163_v1  ;;  %v2177_v3 = vrot.slane %v4769_v41, 3 }
  0xe4   : > { %v690_v44 = vpop.f32.mrf.mxu1  ;;  %v800_v63 = vpop.f32.mrf.mxu2 }
  0xe5   : > { %v814_v14 = vadd.f32 %v800_v63, %v689_v9  ;;  %v940_v4 = vpop.f32.mrf.mxu3  ;;  %v691_v16 = vadd.f32 %v690_v44, %v589_v6  ;;  %v2428_v9 = vor.u32 %v2427_v28, %v2426_v27  ;;  %v2042_v6 = vrot.slane %v4668_v39, 2 }
  0xe6   : > { %v2172_v27 = vrot.slane %v4732_v34, 2  ;;  %v2173_v28 = vrot.slane %v4720_v31, 3 }
  0xe7   : > { %v4818_v18 = vadd.f32 %v940_v4, %v814_v14  ;;  %v4836_v35 = vsel %vm1359_vm3, %v2428_v9, %v2432_v10  ;;  %v2171_v14 = vsel %vm1099_vm4, %v2167_v57, %v2170_v38  ;;  %v2041_v4 = vrot.slane %v2040_v22, 2 }
  0xe8   : > { %v2174_v32 = vor.u32 %v2173_v28, %v2172_v27  ;;  %v2045_v1 = vsel %vm979_vm5, %v2042_v6, %v2044_v42 }
  0xe9   : > { %v2043_v24 = vsel %vm979_vm5, %v2041_v4, %v2042_v6  ;;  %v2046_v4 = vrot.slane %v4756_v59, 2 }
  0xea   : > { %v2175_v31 = vsel %vm1099_vm4, %v2170_v38, %v2174_v32  ;;  %v2178_v38 = vor.u32 %v2177_v3, %v2176_v37 }
  0xeb   : > { %v592_v5 = vpop.f32.mrf.mxu0 }
  0xec   : > { %v693_v19 = vpop.f32.mrf.mxu1  ;;  %v802_v26 = vpop.f32.mrf.mxu2  ;;  %v2179_v17 = vsel %vm1099_vm4, %v2174_v32, %v2178_v38 }
  0xed   : > { %v815_v58 = vadd.f32 %v802_v26, %v691_v16  ;;  %v942_v29 = vpop.f32.mrf.mxu3  ;;  %v694_v46 = vadd.f32 %v693_v19, %v592_v5  ;;  %v2425_v16 = vor.u32 %v2424_v53, %v2421_v43  ;;  %v2301_v26 = vsel %vm1239_vm6, %v2299_v15, %v2300_v56 }
  0xee   : > { %1574 = vmatmul.bf16.gmra.mxu0 %v1498_v30 }
  0xef   : > { %1748 = vmatmul.bf16.gmra.mxu1 %v1672_v20  ;;  %v4831_v45 = vadd.f32 %v942_v29, %v815_v58  ;;  %v2429_v39 = vsel %vm1359_vm3, %v2425_v16, %v2428_v9  ;;  %v4855_v58 = vor.u32 %v2435_v8, %v2434_v7 }
  0xf1   : > { %1867 = vmatmul.bf16.gmra.mxu2 %v1791_v33  ;;  %v2437_v30 = vsel %vm1359_vm3, %v2432_v10, %v4855_v58 }
  0xf2   : > { %2006 = vmatmul.bf16.gmra.mxu3 %v1930_v36 }
  0xf3   : > { %v594_v61 = vpop.f32.mrf.mxu0 }
  0xf4   : > { %v695_v50 = vpop.f32.mrf.mxu1  ;;  %v805_v44 = vpop.f32.mrf.mxu2 }
  0xf5   : > { %v816_v60 = vadd.f32 %v805_v44, %v694_v46  ;;  %v945_v62 = vpop.f32.mrf.mxu3  ;;  %v696_v63 = vadd.f32 %v695_v50, %v594_v61  ;;  %v2302_v46 = vrot.slane %v4711_v0, 3  ;;  %v2139_v44 = vld [vmem:[#allocation2 + $0x24] sm:$0x7] }
  0xf7   : > { %v4838_v40 = vadd.f32 %v945_v62, %v816_v60  ;;  %v2303_v52 = vsel %vm1239_vm6, %v2300_v56, %v2302_v46  ;;  %v2158_v60 = vunpack.c.l.b16 %v2139_v44 }
  0xf9   : > { %v2159_v41 = vpack.c.b16 %v2158_v60, %v2158_v60 }
  0xfb   : > { %v1050_v21 = vpop.f32.mrf.mxu0  ;;  %v2181_v56 = vshrl.u32 %v2159_v41, 16  ;;  %v2184_v16 = vshll.u32 %v2159_v41, 16 }
  0xfc   : > { %v1190_v13 = vpop.f32.mrf.mxu1  ;;  %v807_v19 = vpop.f32.mrf.mxu2  ;;  %v1070_v11 = vadd.f32 %v1050_v21, %v4736_v47 }
  0xfd   : > { %v817_v20 = vadd.f32 %v807_v19, %v696_v63  ;;  %v947_v23 = vpop.f32.mrf.mxu3 }
  0xfe   : > { %2110 = vmatmul.bf16.vlgmr.msrb.gmra.mxu0 %v2043_v24  ;;  %v1210_v29 = vadd.f32 %v1190_v13, %v1070_v11  ;;  %v2397_v13 = vld [vmem:[#allocation2 + $0x24] sm:$0xf]  ;;  %v2183_v11 = vrot.slane %v2181_v56, 2 }
  0xff   : > { %2249 = vmatmul.bf16.vlgmr.msrb.gmra.mxu1 %v2171_v14  ;;  %v4847_v22 = vadd.f32 %v947_v23, %v817_v20  ;;  %v2416_v6 = vunpack.c.l.b16 %v2397_v13 }
 0x101   : > { %2368 = vmatmul.bf16.vlgmr.msrb.gmra.mxu2 %v2301_v26  ;;  %v2417_v24 = vpack.c.b16 %v2416_v6, %v2416_v6 }
 0x102   : > { %2507 = vmatmul.bf16.vlgmr.msrb.gmra.mxu3 %v2429_v39 }
 0x103   : > { %v4859_v33 = vpop.f32.mrf.mxu0  ;;  %v2439_v27 = vshrl.u32 %v2417_v24, 16  ;;  %v2442_v28 = vshll.u32 %v2417_v24, 16 }
 0x104   : > { %v4851_v12 = vpop.f32.mrf.mxu1  ;;  %v1310_v51 = vpop.f32.mrf.mxu2 }
 0x105   : > { %v1330_v47 = vadd.f32 %v1310_v51, %v1210_v29  ;;  %v1450_v5 = vpop.f32.mrf.mxu3 }
 0x107   : > { %v4861_v36 = vadd.f32 %v1450_v5, %v1330_v47 }
 0x10b   : > { %v1055_v50 = vpop.f32.mrf.mxu0 }
 0x10c   : > { %v1195_v34 = vpop.f32.mrf.mxu1  ;;  %v4866_v48 = vpop.f32.mrf.mxu2  ;;  %v1072_v9 = vadd.f32 %v1055_v50, %v4788_v25 }
 0x10d   : > { %v4868_v49 = vpop.f32.mrf.mxu3 }
 0x10e   : > { %2115 = vmatmul.bf16.gmra.mxu0 %v2045_v1  ;;  %v1212_v0 = vadd.f32 %v1195_v34, %v1072_v9  ;;  %v2306_v9 = vrot.slane %v2159_v41, 3 }
 0x10f   : > { %2254 = vmatmul.bf16.gmra.mxu1 %v2175_v31 }
 0x111   : > { %2373 = vmatmul.bf16.gmra.mxu2 %v2303_v52  ;;  %v2048_v52 = vrot.slane %v4809_v54, 2 }
 0x112   : > { %2512 = vmatmul.bf16.gmra.mxu3 %v4836_v35  ;;  %v2304_v35 = vrot.slane %v4756_v59, 3  ;;  %v2186_v59 = vrot.slane %v2184_v16, 3 }
 0x113   : > { %v1057_v63 = vpop.f32.mrf.mxu0  ;;  %v2049_v44 = vsel %vm979_vm5, %v2046_v4, %v2048_v52 }
 0x114   : > { %v1197_v10 = vpop.f32.mrf.mxu1  ;;  %v1315_v57 = vpop.f32.mrf.mxu2  ;;  %v1073_v25 = vadd.f32 %v1057_v63, %v4811_v55  ;;  %v2047_v55 = vsel %vm979_vm5, %v2044_v42, %v2046_v4  ;;  %v2305_v7 = vsel %vm1239_vm6, %v2302_v46, %v2304_v35  ;;  %v2187_v51 = vor.u32 %v2186_v59, %v2183_v11 }
 0x115   : > { %v1332_v62 = vadd.f32 %v1315_v57, %v1212_v0  ;;  %v1455_v61 = vpop.f32.mrf.mxu3  ;;  %v2441_v42 = vrot.slane %v2439_v27, 3  ;;  %v2307_v57 = vsel %vm1239_vm6, %v2304_v35, %v2306_v9 }
 0x116   : > { %v1213_v14 = vadd.f32 %v1197_v10, %v1073_v25  ;;  %v2188_v50 = vsel %vm1099_vm4, %v2178_v38, %v2187_v51 }
 0x117   : > { %v4876_v43 = vadd.f32 %v1455_v61, %v1332_v62 }
 0x11b   : > { %v1060_v23 = vpop.f32.mrf.mxu0 }
 0x11c   : > { %v1200_v53 = vpop.f32.mrf.mxu1  ;;  %v1317_v15 = vpop.f32.mrf.mxu2  ;;  %v1074_v21 = vadd.f32 %v1060_v23, %v4818_v18  ;;  %v2444_v18 = vrot.slane %v2442_v28, 4 }
 0x11d   : > { %v1333_v19 = vadd.f32 %v1317_v15, %v1213_v14  ;;  %v1457_v20 = vpop.f32.mrf.mxu3 }
 0x11e   : > { %2120 = vmatmul.bf16.gmra.mxu0 %v2047_v55  ;;  %v1214_v39 = vadd.f32 %v1200_v53, %v1074_v21 }
 0x11f   : > { %2259 = vmatmul.bf16.gmra.mxu1 %v2179_v17  ;;  %v4884_v8 = vadd.f32 %v1457_v20, %v1333_v19 }
 0x121   : > { %2378 = vmatmul.bf16.gmra.mxu2 %v2305_v7 }
 0x122   : > { %2517 = vmatmul.bf16.gmra.mxu3 %v2437_v30  ;;  %v2445_v30 = vor.u32 %v2444_v18, %v2441_v42 }
 0x123   : > { %v1062_v5 = vpop.f32.mrf.mxu0 }
 0x124   : > { %v1202_v26 = vpop.f32.mrf.mxu1  ;;  %v1320_v29 = vpop.f32.mrf.mxu2  ;;  %v1075_v31 = vadd.f32 %v1062_v5, %v4831_v45  ;;  %v2446_v38 = vsel %vm1359_vm3, %v4855_v58, %v2445_v30 }
 0x125   : > { %v1334_v32 = vadd.f32 %v1320_v29, %v1214_v39  ;;  %v1460_v47 = vpop.f32.mrf.mxu3 }
 0x126   : > { %v1215_v1 = vadd.f32 %v1202_v26, %v1075_v31 }
 0x127   : > { %v1474_v34 = vadd.f32 %v1460_v47, %v1334_v32 }
 0x12b   : > { %v1065_v0 = vpop.f32.mrf.mxu0 }
 0x12c   : > { %v1205_v46 = vpop.f32.mrf.mxu1  ;;  %v1322_v10 = vpop.f32.mrf.mxu2  ;;  %v1076_v60 = vadd.f32 %v1065_v0, %v4838_v40 }
 0x12d   : > { %v1335_v37 = vadd.f32 %v1322_v10, %v1215_v1  ;;  %v1462_v3 = vpop.f32.mrf.mxu3 }
 0x12e   : > { %2125 = vmatmul.bf16.gmra.mxu0 %v2049_v44  ;;  %v1216_v54 = vadd.f32 %v1205_v46, %v1076_v60 }
 0x12f   : > { %2264 = vmatmul.bf16.gmra.mxu1 %v2188_v50  ;;  %v4892_v45 = vadd.f32 %v1462_v3, %v1335_v37 }
 0x131   : > { %2383 = vmatmul.bf16.gmra.mxu2 %v2307_v57 }
 0x132   : > { %2522 = vmatmul.bf16.gmra.mxu3 %v2446_v38 }
 0x133   : > { %v1067_v53 = vpop.f32.mrf.mxu0 }
 0x134   : > { %v1207_v62 = vpop.f32.mrf.mxu1  ;;  %v1325_v61 = vpop.f32.mrf.mxu2  ;;  %v1077_v41 = vadd.f32 %v1067_v53, %v4847_v22 }
 0x135   : > { %v1336_v63 = vadd.f32 %v1325_v61, %v1216_v54  ;;  %v1465_v25 = vpop.f32.mrf.mxu3 }
 0x136   : > { %v1217_v14 = vadd.f32 %v1207_v62, %v1077_v41 }
 0x137   : > { %v4897_v17 = vadd.f32 %v1465_v25, %v1336_v63 }
 0x13b   : > { %v1560_v6 = vpop.f32.mrf.mxu0 }
 0x13c   : > { %v1734_v13 = vpop.f32.mrf.mxu1  ;;  %v1327_v4 = vpop.f32.mrf.mxu2  ;;  %v1580_v15 = vadd.f32 %v1560_v6, %v4861_v36 }
 0x13d   : > { %v1337_v40 = vadd.f32 %v1327_v4, %v1217_v14  ;;  %v1467_v35 = vpop.f32.mrf.mxu3 }
 0x13e   : > { %v1754_v16 = vadd.f32 %v1734_v13, %v1580_v15 }
 0x13f   : > { %v4900_v58 = vadd.f32 %v1467_v35, %v1337_v40 }
 0x143   : > { %v1562_v55 = vpop.f32.mrf.mxu0 }
 0x144   : > { %v1736_v56 = vpop.f32.mrf.mxu1  ;;  %v1853_v19 = vpop.f32.mrf.mxu2 }
 0x145   : > { %v1873_v20 = vadd.f32 %v1853_v19, %v1754_v16  ;;  %v1992_v23 = vpop.f32.mrf.mxu3 }
 0x147   : > { %v2012_v7 = vadd.f32 %v1992_v23, %v1873_v20  ;;  %v4944_v20 = vld [vmem:[%s5058_s4] ss:$0 sm:$0xff] }
 0x14b   : > { %v1565_v26 = vpop.f32.mrf.mxu0 }
 0x14c   : > { %v1739_v21 = vpop.f32.mrf.mxu1  ;;  %v1855_v24 = vpop.f32.mrf.mxu2  ;;  %v1582_v11 = vadd.f32 %v1565_v26, %v4876_v43 }
 0x14d   : > { %v1994_v22 = vpop.f32.mrf.mxu3 }
 0x14e   : > { %v1756_v39 = vadd.f32 %v1739_v21, %v1582_v11 }
 0x153   : > { %v1567_v51 = vpop.f32.mrf.mxu0 }
 0x154   : > { %v1741_v59 = vpop.f32.mrf.mxu1  ;;  %v1858_v27 = vpop.f32.mrf.mxu2  ;;  %v1583_v19 = vadd.f32 %v1567_v51, %v4884_v8 }
 0x155   : > { %v1875_v28 = vadd.f32 %v1858_v27, %v1756_v39  ;;  %v1997_v29 = vpop.f32.mrf.mxu3 }
 0x157   : > { %v2014_v36 = vadd.f32 %v1997_v29, %v1875_v28 }
 0x15b   : > { %v1570_v31 = vpop.f32.mrf.mxu0 }
 0x15c   : > { %v1744_v32 = vpop.f32.mrf.mxu1  ;;  %v1860_v47 = vpop.f32.mrf.mxu2  ;;  %v1584_v42 = vadd.f32 %v1570_v31, %v1474_v34  ;;  %v1071_v34 = vadd.f32 %v4859_v33, %v4761_v2 }
 0x15d   : > { %v4904_v5 = vpop.f32.mrf.mxu3 }
 0x15e   : > { %v1758_v46 = vadd.f32 %v1744_v32, %v1584_v42  ;;  %v1211_v44 = vadd.f32 %v4851_v12, %v1071_v34 }
 0x160   : > { %v1331_v60 = vadd.f32 %v4866_v48, %v1211_v44  ;;  %v3977_v44 = vld [vmem:[%s5059_s5 + $0x28] sm:$0xff] }
 0x162   : > { %v1471_v61 = vadd.f32 %v4868_v49, %v1331_v60  ;;  %v3979_v49 = vld [vmem:[%s5059_s5 + $0x38] sm:$0xff] }
 0x163   : > { %v4908_v43 = vpop.f32.mrf.mxu0  ;;  %2676 = vmatpush.bf16.msra.mxu0 %v3979_v49  ;;  %2708 = vmatpush.bf16.msra.mxu1 %v3979_v49 }
 0x164   : > { %v4906_v18 = vpop.f32.mrf.mxu1  ;;  %v1863_v50 = vpop.f32.mrf.mxu2  ;;  %v1581_v63 = vadd.f32 %v1562_v55, %v1471_v61 }
 0x165   : > { %v1877_v1 = vadd.f32 %v1863_v50, %v1758_v46  ;;  %v2002_v52 = vpop.f32.mrf.mxu3 }
 0x166   : > { %v1755_v33 = vadd.f32 %v1736_v56, %v1581_v63 }
 0x167   : > { %v4910_v9 = vadd.f32 %v2002_v52, %v1877_v1 }
 0x168   : > { %v1874_v12 = vadd.f32 %v1855_v24, %v1755_v33  ;;  %v3978_v24 = vld [vmem:[%s5059_s5 + $0x30] sm:$0xff] }
 0x169   : > { %2677 = vmatpush.bf16.msra.mxu0 %v3978_v24  ;;  %2709 = vmatpush.bf16.msra.mxu1 %v3978_v24 }
 0x16a   : > { %v2013_v4 = vadd.f32 %v1994_v22, %v1874_v12  ;;  %v1757_v22 = vadd.f32 %v1741_v59, %v1583_v19 }
 0x16b   : > { %v4918_v3 = vpop.f32.mrf.mxu0 }
 0x16c   : > { %v4912_v30 = vpop.f32.mrf.mxu1  ;;  %v4914_v10 = vpop.f32.mrf.mxu2  ;;  %v1876_v27 = vadd.f32 %v1860_v47, %v1757_v22 }
 0x16d   : > { %v4916_v37 = vpop.f32.mrf.mxu3  ;;  %2678 = vmatpush.bf16.msra.mxu0 %v3977_v44  ;;  %2710 = vmatpush.bf16.msra.mxu1 %v3977_v44 }
 0x16e   : > { %v2015_v59 = vadd.f32 %v4904_v5, %v1876_v27  ;;  %v1585_v5 = vadd.f32 %v4908_v43, %v4892_v45 }
 0x173   : > { %v4930_v62 = vpop.f32.mrf.mxu0 }
 0x174   : > { %v4922_v0 = vpop.f32.mrf.mxu1  ;;  %v4925_v57 = vpop.f32.mrf.mxu2 }
 0x175   : > { %v4928_v38 = vpop.f32.mrf.mxu3 }
 0x17b   : > { %v2111_v2 = vpop.f32.mrf.mxu0 }
 0x17c   : > { %v2250_v54 = vpop.f32.mrf.mxu1  ;;  %v4933_v25 = vpop.f32.mrf.mxu2  ;;  %v2131_v13 = vadd.f32 %v2111_v2, %v2012_v7 }
 0x17d   : > { %v4935_v53 = vpop.f32.mrf.mxu3 }
 0x17e   : > { %v2270_v48 = vadd.f32 %v2250_v54, %v2131_v13  ;;  %v3976_v13 = vld [vmem:[%s5059_s5 + $0x20] sm:$0xff] }
 0x17f   : > { %2679 = vmatpush.bf16.msra.mxu0 %v3976_v13  ;;  %2711 = vmatpush.bf16.msra.mxu1 %v3976_v13 }
 0x183   : > { %v2113_v35 = vpop.f32.mrf.mxu0 }
 0x184   : > { %v2252_v41 = vpop.f32.mrf.mxu1  ;;  %v2369_v14 = vpop.f32.mrf.mxu2  ;;  %v2132_v15 = vadd.f32 %v2113_v35, %v2013_v4  ;;  %v1759_v4 = vadd.f32 %v4906_v18, %v1585_v5  ;;  %v1586_v35 = vadd.f32 %v4918_v3, %v4897_v17 }
 0x185   : > { %v2508_v40 = vpop.f32.mrf.mxu3  ;;  %v2389_v6 = vadd.f32 %v2369_v14, %v2270_v48 }
 0x186   : > { %v2271_v23 = vadd.f32 %v2252_v41, %v2132_v15  ;;  %v1878_v45 = vadd.f32 %v4914_v10, %v1759_v4 }
 0x187   : > { %v2528_v56 = vadd.f32 %v2508_v40, %v2389_v6 }
 0x189   : > { %v2540_v11 = vadd.f32 %v4944_v20, %v2528_v56 }
 0x18b   : > { %v2116_v26 = vpop.f32.mrf.mxu0  ;;  %v4951_v51 = vmax.f32 %v2540_v11, 0.0 }
 0x18c   : > { %v2255_v16 = vpop.f32.mrf.mxu1  ;;  %v2371_v55 = vpop.f32.mrf.mxu2  ;;  %v2133_v8 = vadd.f32 %v2116_v26, %v2014_v36 }
 0x18d   : > { %v2390_v7 = vadd.f32 %v2371_v55, %v2271_v23  ;;  %v2510_v21 = vpop.f32.mrf.mxu3  ;;  %v1760_v55 = vadd.f32 %v4912_v30, %v1586_v35 }
 0x18e   : > { %v2272_v31 = vadd.f32 %v2255_v16, %v2133_v8  ;;  %v2017_v16 = vadd.f32 %v4916_v37, %v1878_v45  ;;  %v1587_v37 = vadd.f32 %v4930_v62, %v4900_v58 }
 0x18f   : > { %v2529_v39 = vadd.f32 %v2510_v21, %v2390_v7  ;;  %v1879_v3 = vadd.f32 %v4925_v57, %v1760_v55  ;;  %v3984_v55 = vld [vmem:[%s5059_s5 + $0x60] sm:$0xff] }
 0x191   : > { %v2541_v28 = vadd.f32 %v4944_v20, %v2529_v39  ;;  %v2018_v11 = vadd.f32 %v4928_v38, %v1879_v3  ;;  %v3975_v38 = vld [vmem:[%s5059_s5 + $0x18] sm:$0xff]  ;;  %v2572_v3 = vld [vmem:[#allocation3] sm:$0x1] }
 0x192   : > { %2680 = vmatpush.bf16.msra.mxu0 %v3975_v38  ;;  %2712 = vmatpush.bf16.msra.mxu1 %v3975_v38 }
 0x193   : > { %v4953_v32 = vmax.f32 %v2541_v28, 0.0  ;;  %v2118_v47 = vpop.f32.mrf.mxu0  ;;  %v1761_v28 = vadd.f32 %v4922_v0, %v1587_v37 }
 0x194   : > { %v2257_v29 = vpop.f32.mrf.mxu1  ;;  %v2374_v42 = vpop.f32.mrf.mxu2  ;;  %v2134_v34 = vadd.f32 %v2118_v47, %v2015_v59 }
 0x195   : > { %v4007_v46 = vpack.c.bf16 %v4953_v32, %v4951_v51  ;;  %v2573_v36 = vadd.f32 %v4953_v32, %v4951_v51  ;;  %v2391_v50 = vadd.f32 %v2374_v42, %v2272_v31  ;;  %v2513_v1 = vpop.f32.mrf.mxu3  ;;  %v1880_v42 = vadd.f32 %v4933_v25, %v1761_v28 }
 0x196   : > { %v2273_v61 = vadd.f32 %v2257_v29, %v2134_v34 }
 0x197   : > { %4008 = vst [vmem:[%s4177_s18] sm:$0xff] %v4007_v46   ;;  %v2530_v52 = vadd.f32 %v2513_v1, %v2391_v50 }
 0x199   : > { %v2542_v60 = vadd.f32 %v4944_v20, %v2530_v52  ;;  %v3974_v52 = vld [vmem:[%s5059_s5 + $0x10] sm:$0xff] }
 0x19a   : > { %2681 = vmatpush.bf16.msra.mxu0 %v3974_v52  ;;  %2713 = vmatpush.bf16.msra.mxu1 %v3974_v52 }
 0x19b   : > { %v4967_v54 = vmax.f32 %v2542_v60, 0.0  ;;  %v2121_v14 = vpop.f32.mrf.mxu0 }
 0x19c   : > { %v2260_v63 = vpop.f32.mrf.mxu1  ;;  %v2376_v2 = vpop.f32.mrf.mxu2  ;;  %v2135_v40 = vadd.f32 %v2121_v14, %v4910_v9 }
 0x19d   : > { %v2574_v33 = vadd.f32 %v2573_v36, %v4967_v54  ;;  %v2392_v41 = vadd.f32 %v2376_v2, %v2273_v61  ;;  %v2515_v12 = vpop.f32.mrf.mxu3  ;;  %v3973_v61 = vld [vmem:[%s5059_s5 + $0x8] sm:$0xff] }
 0x19e   : > { %v2274_v15 = vadd.f32 %v2260_v63, %v2135_v40  ;;  %2682 = vmatpush.bf16.msra.mxu0 %v3973_v61  ;;  %2714 = vmatpush.bf16.msra.mxu1 %v3973_v61 }
 0x19f   : > { %v2531_v48 = vadd.f32 %v2515_v12, %v2392_v41 }
 0x1a1   : > { %v2543_v43 = vadd.f32 %v4944_v20, %v2531_v48 }
 0x1a3   : > { %v4979_v6 = vmax.f32 %v2543_v43, 0.0  ;;  %v2123_v10 = vpop.f32.mrf.mxu0  ;;  %v3987_v43 = vld [vmem:[%s5059_s5 + $0x78] sm:$0xff] }
 0x1a4   : > { %v2379_v49 = vpop.f32.mrf.mxu2  ;;  %v2262_v23 = vpop.f32.mrf.mxu1  ;;  %v2136_v17 = vadd.f32 %v2123_v10, %v2017_v16  ;;  %2771 = vmatpush.bf16.msra.mxu2 %v3987_v43  ;;  %2784 = vmatpush.bf16.msra.mxu3 %v3987_v43 }
 0x1a5   : > { %v4012_v18 = vpack.c.bf16 %v4979_v6, %v4967_v54  ;;  %v2575_v9 = vadd.f32 %v2574_v33, %v4979_v6  ;;  %v2393_v19 = vadd.f32 %v2379_v49, %v2274_v15  ;;  %v2518_v56 = vpop.f32.mrf.mxu3  ;;  %v3972_v33 = vld [vmem:[%s5059_s5] sm:$0xff] }
 0x1a6   : > { %v2275_v22 = vadd.f32 %v2262_v23, %v2136_v17  ;;  %2683 = vmatpush.bf16.msra.mxu0 %v3972_v33  ;;  %2715 = vmatpush.bf16.msra.mxu1 %v3972_v33 }
 0x1a7   : > { %4037 = vst [vmem:[%s4177_s18 + $0x8] sm:$0xff] %v4012_v18   ;;  %v2532_v7 = vadd.f32 %v2518_v56, %v2393_v19  ;;  %v3985_v19 = vld [vmem:[%s5059_s5 + $0x68] sm:$0xff] }
 0x1a9   : > { %v2544_v21 = vadd.f32 %v4944_v20, %v2532_v7 }
 0x1ab   : > { %v2552_v24 = vmax.f32 %v2544_v21, 0.0  ;;  %v2126_v29 = vpop.f32.mrf.mxu0 }
 0x1ac   : > { %v2381_v26 = vpop.f32.mrf.mxu2  ;;  %v2137_v57 = vadd.f32 %v2126_v29, %v2018_v11  ;;  %v2265_v59 = vpop.f32.mrf.mxu1  ;;  %v2588_v11 = vld [vmem:[#allocation4] sm:$0x1] }
 0x1ad   : > { %v2576_v39 = vadd.f32 %v2575_v9, %v2552_v24  ;;  %v2589_v8 = vmax.f32 %v4951_v51, %v2552_v24  ;;  %v2394_v27 = vadd.f32 %v2381_v26, %v2275_v22  ;;  %v2520_v30 = vpop.f32.mrf.mxu3  ;;  %v2019_v51 = vadd.f32 %v4935_v53, %v1880_v42 }
 0x1ae   : > { %v2276_v46 = vadd.f32 %v2265_v59, %v2137_v57 }
 0x1af   : > { %v2533_v31 = vadd.f32 %v2520_v30, %v2394_v27  ;;  %v3981_v30 = vld [vmem:[%s5059_s5 + $0x48] sm:$0xff] }
 0x1b1   : > { %v2545_v58 = vadd.f32 %v4944_v20, %v2533_v31  ;;  %v3980_v31 = vld [vmem:[%s5059_s5 + $0x40] sm:$0xff] }
 0x1b3   : > { %v2553_v62 = vmax.f32 %v2545_v58, 0.0  ;;  %v2128_v34 = vpop.f32.mrf.mxu0 }
 0x1b4   : > { %v2384_v0 = vpop.f32.mrf.mxu2  ;;  %v2138_v5 = vadd.f32 %v2128_v34, %v2019_v51 }
 0x1b5   : > { %v4017_v36 = vpack.c.bf16 %v2553_v62, %v2552_v24  ;;  %v2577_v50 = vadd.f32 %v2576_v39, %v2553_v62  ;;  %v2590_v1 = vmax.f32 %v4953_v32, %v2553_v62  ;;  %v2395_v25 = vadd.f32 %v2384_v0, %v2276_v46  ;;  %v2523_v47 = vpop.f32.mrf.mxu3  ;;  %v2267_v32 = vpop.f32.mrf.mxu1  ;;  %v3983_v24 = vld [vmem:[%s5059_s5 + $0x58] sm:$0xff] }
 0x1b6   : > { %v2277_v2 = vadd.f32 %v2267_v32, %v2138_v5 }
 0x1b7   : > { %4038 = vst [vmem:[%s4177_s18 + $0x10] sm:$0xff] %v4017_v36   ;;  %v2593_v44 = vmax.f32 %v2589_v8, %v2590_v1  ;;  %v2534_v60 = vadd.f32 %v2523_v47, %v2395_v25  ;;  %v3982_v8 = vld [vmem:[%s5059_s5 + $0x50] sm:$0xff] }
 0x1b9   : > { %v2546_v53 = vadd.f32 %v4944_v20, %v2534_v60 }
 0x1bb   : > { %v2554_v63 = vmax.f32 %v2546_v53, 0.0 }
 0x1bc   : > { %v2386_v41 = vpop.f32.mrf.mxu2 }
 0x1bd   : > { %v2578_v12 = vadd.f32 %v2577_v50, %v2554_v63  ;;  %v2591_v13 = vmax.f32 %v4967_v54, %v2554_v63  ;;  %v2396_v14 = vadd.f32 %v2386_v41, %v2277_v2  ;;  %v2525_v4 = vpop.f32.mrf.mxu3  ;;  %v3986_v54 = vld [vmem:[%s5059_s5 + $0x70] sm:$0xff] }
 0x1be   : > { %2772 = vmatpush.bf16.msra.mxu2 %v3986_v54  ;;  %2785 = vmatpush.bf16.msra.mxu3 %v3986_v54 }
 0x1bf   : > { %v2535_v48 = vadd.f32 %v2525_v4, %v2396_v14 }
 0x1c1   : > { %v2547_v40 = vadd.f32 %v4944_v20, %v2535_v48 }
 0x1c2   : > { %2773 = vmatpush.bf16.msra.mxu2 %v3985_v19  ;;  %2786 = vmatpush.bf16.msra.mxu3 %v3985_v19 }
 0x1c3   : > { %v2555_v45 = vmax.f32 %v2547_v40, 0.0 }
 0x1c5   : > { %v4022_v35 = vpack.c.bf16 %v2555_v45, %v2554_v63  ;;  %v2579_v15 = vadd.f32 %v2578_v12, %v2555_v45  ;;  %v2592_v49 = vmax.f32 %v4979_v6, %v2555_v45 }
 0x1c6   : > { %2774 = vmatpush.bf16.msra.mxu2 %v3984_v55  ;;  %2787 = vmatpush.bf16.msra.mxu3 %v3984_v55 }
 0x1c7   : > { %4039 = vst [vmem:[%s4177_s18 + $0x18] sm:$0xff] %v4022_v35   ;;  %v2580_v16 = vrot.slane %v2579_v15, 4  ;;  %v2594_v18 = vmax.f32 %v2591_v13, %v2592_v49 }
 0x1c9   : > { %v2581_v9 = vadd.f32 %v2580_v16, %v2579_v15  ;;  %v2595_v20 = vmax.f32 %v2593_v44, %v2594_v18 }
 0x1ca   : > { %2775 = vmatpush.bf16.msra.mxu2 %v3983_v24  ;;  %2788 = vmatpush.bf16.msra.mxu3 %v3983_v24 }
 0x1cb   : > { %v2582_v56 = vrot.slane %v2581_v9, 2  ;;  %v2596_v23 = vrot.slane %v2595_v20, 4 }
 0x1cd   : > { %v2583_v6 = vadd.f32 %v2582_v56, %v2581_v9  ;;  %v2597_v10 = vmax.f32 %v2595_v20, %v2596_v23 }
 0x1ce   : > { %2776 = vmatpush.bf16.msra.mxu2 %v3982_v8  ;;  %2789 = vmatpush.bf16.msra.mxu3 %v3982_v8 }
 0x1cf   : > { %v2584_v7 = vrot.slane %v2583_v6, 1  ;;  %v2598_v17 = vrot.slane %v2597_v10, 2 }
 0x1d1   : > { %v2585_v21 = vadd.f32 %v2584_v7, %v2583_v6  ;;  %v2599_v37 = vmax.f32 %v2597_v10, %v2598_v17 }
 0x1d2   : > { %2777 = vmatpush.bf16.msra.mxu2 %v3981_v30  ;;  %2790 = vmatpush.bf16.msra.mxu3 %v3981_v30 }
 0x1d3   : > { %v2586_v22 = vadd.f32 %v2585_v21, %v2572_v3  ;;  %v2600_v26 = vrot.slane %v2599_v37, 1 }
 0x1d5   : > { %2587 = vst [vmem:[#allocation3] sm:$0x1] %v2586_v22  ;;  %v2601_v39 = vmax.f32 %v2599_v37, %v2600_v26 }
 0x1d6   : > { %2778 = vmatpush.bf16.msra.mxu2 %v3980_v31  ;;  %2791 = vmatpush.bf16.msra.mxu3 %v3980_v31 }
 0x1d7   : > { %v2602_v27 = vmax.f32 %v2588_v11, %v2601_v39 }
 0x1d9   : > { %2603 = vst [vmem:[#allocation4] sm:$0x1] %v2602_v27 }
 0x1dc   : > { %v2607_v28 = vld [vmem:[#allocation3] sm:$0x1] }
 0x1dd   : > { %v2608_v29 = vmul.f32 0.015625, %v2607_v28 }
 0x1df   : > { %v2609_v57 = vpack.c.bf16 %v2608_v29, %v2608_v29 }
 0x1e0   : > { %v2610_v42 = vld [vmem:[#allocation4] sm:$0x1] }
 0x1e1   : > { %2684 = vmatmul.bf16.vlgmr.msra.gmra.mxu0 %v2609_v57  ;;  %v2611_v59 = vpack.c.bf16 %v2610_v42, %v2610_v42 }
 0x1e3   : > { %2716 = vmatmul.bf16.vlgmr.msra.gmra.mxu1 %v2611_v59 }
 0x25e   : > { %v2685_v58 = vpop.f32.mrf.mxu0 }
 0x25f   : > { %v2689_v38 = vmax.f32 %v2685_v58, 0.0 }
 0x260   : > { %v2717_v62 = vpop.f32.mrf.mxu1 }
 0x261   : > { %v2690_v46 = vpack.c.bf16 %v2689_v38, %v2689_v38  ;;  %v2721_v51 = vmax.f32 %v2717_v62, 0.0 }
 0x263   : > { %v2722_v0 = vpack.c.bf16 %v2721_v51, %v2721_v51  ;;  %2792 = vmatmul.bf16.vlgmr.msra.gmra.mxu3 %v2690_v46 }
 0x265   : > { %2779 = vmatmul.bf16.vlgmr.msra.gmra.mxu2 %v2722_v0 }
 0x266   : > { %v2687_v36 = vpop.f32.mrf.mxu0 }
 0x268   : > { %v2719_v50 = vpop.f32.mrf.mxu1 }
 0x2e6   : > { %v2793_v1 = vpop.f32.mrf.mxu3 }
 0x2e8   : > { %v2780_v25 = vpop.f32.mrf.mxu2 }
 0x2e9   : > { %v2794_v47 = vadd.f32 %v2793_v1, %v2780_v25 }
 0x2eb   : > { %v3827_v52 = vmul.f32 -1.442695, %v2794_v47 }
 0x2ed   : > { %4071 = vpow2.f32 %v3827_v52 }
 0x2ee   : > { %v2795_v34 = vpop.f32.mrf.mxu3 }
 0x2f0   : > { %v2782_v44 = vpop.f32.mrf.mxu2 }
 0x2f3   : > { %v4072_v60 = vpop.eup %4071 }
 0x2f4   : > { %v2800_v5 = vadd.f32 1.0, %v4072_v60 }
 0x2f6   : > { %4073 = vrcp.f32 %v2800_v5  ;;  %v2812_v63 = vand.u32 2147483648, %v2800_v5  ;;  %v2810_v33 = vand.u32 2147483647, %v2800_v5  ;;  %vm2806_vm8 = vweird.f32 %v2800_v5 }
 0x2f8   : > { %v2813_v12 = vor.u32 1.1754944e-38, %v2812_v63  ;;  %vm2811_vm10 = vcmp.eq.f32.partialorder %v2810_v33, 8.507059e+37 }
 0x2fc   : > { %v4074_v53 = vpop.eup %4073 }
 0x2fd   : > { %v2802_v61 = vmul.f32 %v4074_v53, %v2800_v5  ;;  %vm2807_vm7 = vweird.f32 %v4074_v53 }
 0x2fe   : > { %vm2808_vm9 = vmor %vm2806_vm8, %vm2807_vm7 }
 0x2ff   : > { %v2803_v32 = vsub.f32 1.0, %v2802_v61 }
 0x301   : > { %v2804_v2 = vmul.f32 %v4074_v53, %v2803_v32 }
 0x303   : > { %v2805_v41 = vadd.f32 %v4074_v53, %v2804_v2 }
 0x305   : > { %v2809_v13 = vsel %vm2808_vm9, %v4074_v53, %v2805_v41 }
 0x306   : > { %v2814_v14 = vsel %vm2811_vm10, %v2813_v12, %v2809_v13 }
 0x307   : > { %2816 = vst [vmem:[%s300_s12] sm:$0x1] %v2814_v14 }
 0x308 PF: > { %s18_s26 = sadd.s32 1, %s4099_s26   ;;  %s5062_s24 = smov %s4095_s25 }
 0x309   : > { %p15_p5 = scmp.ge.s32.totalorder %s18_s26, 4   ;;  %s5063_s25 = smov %s5065_s27 }
 0x30b   :  { %17 = sbr.rel (!%p15_p5) target bundleno = 2 (0x2), region = 164 }
 0x310   :  { %2859 = vsyncmov [#allocation5] }
 0x313   :  { %s2860_s20 = vpop.sfrf %2859 }
 0x314   :  { %p3830_p6 = scmp.ne.s32.totalorder %s2860_s20, 0 }
 0x316   :  { %2864 = shalt.err (%p3830_p6)  }
 0x317   :  { %2866 = vsyncmov [#allocation5 + $0x1] }
 0x31a   :  { %s2867_s21 = vpop.sfrf %2866 }
 0x31b   :  { %p3831_p7 = scmp.ne.s32.totalorder %s2867_s21, 0 }
 0x31d   :  { %2871 = shalt.err (%p3831_p7)  }

</bundles_post_ra>
